<compile_context>
chip_gen: v7x
topology: tpu7x:2x2x1
jax: 0.10.0
libtpu: 0.0.40
codegen_flags: <defaults>
</compile_context>

<pallas_src>
import jax
import jax.numpy as jnp
from jax.experimental import pallas as pl
from jax.experimental.pallas import tpu as pltpu

# ---- model config (small, forward-consistent) --------------------------------
B, T = 2, 8          # batch, sequence length
V, E = 32, 16        # vocab size, word-embedding dim
H = 16               # lstm_dim // 2  (per-direction hidden)
D = 2 * H            # lstm_dim
C = 8                # ner_class

# ---- TPU layout constants -----------------------------------------------------
B_PAD = 8            # pad batch to sublane count -> (8, lanes) row blocks
GP = 128             # one vreg lane block per gate (shared by both directions)
NG = 4               # gates per direction (i, f, g, o) -- PyTorch order
BWD = 64             # lane offset of the backward direction inside each block
                     # (fwd occupies lanes 0:H, bwd occupies lanes BWD:BWD+H)


# ------------------------------ Pallas kernel ----------------------------------
def ner_loss_kernel(emb_ref, mask_ref, onehot_ref,
                    w_in_ref, b_in_ref, w_hh_ref,
                    w_cls_ref, b_cls_ref,
                    loss_ref,
                    gin_ref, out_ref):
    """Fused Bi-LSTM (lane-packed fwd+bwd) + linear classifier + CE in VMEM."""

    # ---- single fused input projection for BOTH directions, all gates --------
    # emb_ref row block s carries emb(t=s) in lanes 0:E and emb(t=T-1-s) in
    # lanes BWD:BWD+E, so row block s of gin holds exactly what step s needs.
    gin_ref[...] = (jnp.dot(emb_ref[...], w_in_ref[...],
                            preferred_element_type=jnp.float32)
                    + b_in_ref[...])                         # (T*B_PAD, 4*GP)

    h = jnp.zeros((B_PAD, GP), jnp.float32)   # fwd lanes 0:H | bwd lanes BWD:BWD+H
    c = jnp.zeros((B_PAD, GP), jnp.float32)

    # ---- fused, fully-unrolled bidirectional recurrence -----------------------
    # T is small & static: full unroll keeps scheduler visibility across steps.
    for s in range(T):
        rf = s * B_PAD                 # static, sublane-aligned row offsets
        rb = (T - 1 - s) * B_PAD

        # one recurrent MXU push per step (block-structured Whh keeps the two
        # directions from mixing)
        gates = gin_ref[rf:rf + B_PAD, :] + jnp.dot(
            h, w_hh_ref[...], preferred_element_type=jnp.float32)   # (8, 4*GP)

        i_g = jax.nn.sigmoid(gates[:, 0 * GP:1 * GP])
        f_g = jax.nn.sigmoid(gates[:, 1 * GP:2 * GP])
        g_g = jnp.tanh(gates[:, 2 * GP:3 * GP])
        o_g = jax.nn.sigmoid(gates[:, 3 * GP:4 * GP])
        c_new = f_g * c + i_g * g_g
        h_new = o_g * jnp.tanh(c_new)

        # combined mask: lanes 0:BWD hold mask(t=s), lanes BWD:GP hold
        # mask(t=T-1-s) -> one compare, one set of selects per step
        keep = mask_ref[rf:rf + B_PAD, :] > 0.0
        h = jnp.where(keep, h_new, h)          # carried state (frozen on pad)
        c = jnp.where(keep, c_new, c)
        out = jnp.where(keep, h_new, 0.0)      # emitted output (0 on pad)

        # two full (8,128)-vreg stores; fwd half of `out` is valid for time s,
        # bwd half is valid for time T-1-s.  Garbage lanes of each slab are
        # multiplied by zero Wcls rows below.
        out_ref[rf:rf + B_PAD, 0:GP] = out
        out_ref[rb:rb + B_PAD, GP:2 * GP] = out

    # ---- classifier: one (T*B_PAD, 2*GP) @ (2*GP, GP) matmul -------------------
    # padded classes carry a -1e30 bias -> exp() == 0, softmax unaffected
    logits = (jnp.dot(out_ref[...], w_cls_ref[...],
                      preferred_element_type=jnp.float32)
              + b_cls_ref[...])                                # (T*B_PAD, GP)

    # ---- cross entropy, mean over all B*T positions (PyTorch default) ---------
    row_max = jnp.max(logits, axis=-1, keepdims=True)
    lse = row_max + jnp.log(jnp.sum(jnp.exp(logits - row_max),
                                    axis=-1, keepdims=True))
    # batch-validity already folded into onehot_ref (zero rows for batch pad)
    per_row = jnp.sum(onehot_ref[...] * (lse - logits), axis=-1, keepdims=True)
    loss_ref[...] = jnp.sum(per_row, axis=0, keepdims=True) / float(T * B)


# ------------------------------ host-side wrapper -------------------------------
def ner_loss_pallas(tokens, masks, labels, params):
    f32 = jnp.float32

    # ---- plain-JAX glue: embedding gather (dropout = identity in eval) --------
    emb = params['word_emb'][tokens]                           # (B,T,E)
    emb_t = jnp.transpose(emb, (1, 0, 2))                      # (T,B,E)
    emb_tp = jnp.pad(emb_t, ((0, 0), (0, B_PAD - B), (0, 0)))  # (T,B_PAD,E)

    # combined operand: fwd half = emb(t), bwd half = emb(T-1-t)
    emb_comb = jnp.zeros((T, B_PAD, GP), f32)
    emb_comb = emb_comb.at[:, :, 0:E].set(emb_tp)
    emb_comb = emb_comb.at[:, :, BWD:BWD + E].set(emb_tp[::-1])
    emb_comb = emb_comb.reshape(T * B_PAD, GP)

    # combined mask: lanes 0:BWD = mask(t), lanes BWD:GP = mask(T-1-t)
    m_t = jnp.transpose(masks.astype(f32))                     # (T,B)
    m_tp = jnp.pad(m_t, ((0, 0), (0, B_PAD - B)))              # (T,B_PAD)
    mask_comb = jnp.concatenate(
        [jnp.broadcast_to(m_tp[:, :, None], (T, B_PAD, BWD)),
         jnp.broadcast_to(m_tp[::-1][:, :, None], (T, B_PAD, GP - BWD))],
        axis=-1).reshape(T * B_PAD, GP)

    # one-hot targets with batch-validity weight folded in (no sub-lane wrow)
    lbl_p = jnp.pad(jnp.transpose(labels),
                    ((0, 0), (0, B_PAD - B))).reshape(T * B_PAD)
    wrow = jnp.pad(jnp.ones((T, B), f32),
                   ((0, 0), (0, B_PAD - B))).reshape(T * B_PAD, 1)
    onehot_w = jax.nn.one_hot(lbl_p, GP, dtype=f32) * wrow     # (T*B_PAD,GP)

    # ---- weight re-layout: shared 128-lane gate blocks, fwd 0:H / bwd BWD:BWD+H
    w_in = jnp.zeros((GP, NG * GP), f32)          # rows: fwd emb 0:E, bwd emb BWD:BWD+E
    w_hh = jnp.zeros((GP, NG * GP), f32)          # rows: fwd h 0:H,  bwd h  BWD:BWD+H
    b_in = jnp.zeros((1, NG * GP), f32)
    for g in range(NG):
        cf = g * GP                                # fwd lanes of gate block g
        cb = g * GP + BWD                          # bwd lanes of gate block g
        w_in = w_in.at[0:E, cf:cf + H].set(params['wih_f'][:, g * H:(g + 1) * H])
        w_in = w_in.at[BWD:BWD + E, cb:cb + H].set(params['wih_b'][:, g * H:(g + 1) * H])
        w_hh = w_hh.at[0:H, cf:cf + H].set(params['whh_f'][:, g * H:(g + 1) * H])
        w_hh = w_hh.at[BWD:BWD + H, cb:cb + H].set(params['whh_b'][:, g * H:(g + 1) * H])
        b_in = b_in.at[0, cf:cf + H].set(params['b_f'][0, g * H:(g + 1) * H])
        b_in = b_in.at[0, cb:cb + H].set(params['b_b'][0, g * H:(g + 1) * H])

    # classifier rows laid out to match the packed hidden slabs:
    #   slab 1 (rows 0:GP)     -> only fwd rows 0:H are live
    #   slab 2 (rows GP:2*GP)  -> only bwd rows GP+BWD : GP+BWD+H are live
    w_cls = jnp.zeros((2 * GP, GP), f32)
    w_cls = w_cls.at[0:H, 0:C].set(params['wcls'][0:H, :])
    w_cls = w_cls.at[GP + BWD:GP + BWD + H, 0:C].set(params['wcls'][H:2 * H, :])
    b_cls = jnp.full((1, GP), -1e30, f32)
    b_cls = b_cls.at[0, 0:C].set(params['bcls'][0, :])

    n_in = 8
    vmem = pl.BlockSpec(memory_space=pltpu.MemorySpace.VMEM)
    out = pl.pallas_call(
        ner_loss_kernel,
        out_shape=jax.ShapeDtypeStruct((1, 1), jnp.float32),
        in_specs=[vmem] * n_in,
        out_specs=vmem,
        scratch_shapes=[pltpu.VMEM((T * B_PAD, NG * GP), jnp.float32),  # fused gin
                        pltpu.VMEM((T * B_PAD, 2 * GP), jnp.float32)],  # bilstm out
    )(emb_comb, mask_comb, onehot_w,
      w_in, b_in, w_hh,
      w_cls, b_cls)
    return out[0, 0]


# ----------------------------- pure-JAX reference -------------------------------
def ner_loss_reference(tokens, masks, labels, params):
    emb = params['word_emb'][tokens]                  # (B,T,E)
    m = masks.astype(jnp.float32)

    def run_dir(wih, whh, b, reverse):
        def step(carry, xs):
            h, c = carry
            x, mt = xs                                # (B,E), (B,)
            gates = x @ wih + h @ whh + b
            i_g = jax.nn.sigmoid(gates[:, :H])
            f_g = jax.nn.sigmoid(gates[:, H:2 * H])
            g_g = jnp.tanh(gates[:, 2 * H:3 * H])
            o_g = jax.nn.sigmoid(gates[:, 3 * H:])
            c_new = f_g * c + i_g * g_g
            h_new = o_g * jnp.tanh(c_new)
            mt_ = mt[:, None]
            out = jnp.where(mt_ > 0, h_new, 0.0)
            return (jnp.where(mt_ > 0, h_new, h),
                    jnp.where(mt_ > 0, c_new, c)), out
        init = (jnp.zeros((B, H), jnp.float32), jnp.zeros((B, H), jnp.float32))
        _, outs = jax.lax.scan(step, init,
                               (jnp.transpose(emb, (1, 0, 2)), m.T),
                               reverse=reverse)
        return outs                                   # (T,B,H)

    of = run_dir(params['wih_f'], params['whh_f'], params['b_f'], False)
    ob = run_dir(params['wih_b'], params['whh_b'], params['b_b'], True)
    lstm_out = jnp.concatenate([of, ob], -1).transpose(1, 0, 2)   # (B,T,D)
    logits = lstm_out @ params['wcls'] + params['bcls']           # (B,T,C)
    logp = jax.nn.log_softmax(logits, axis=-1)
    nll = -jnp.take_along_axis(logp, labels[..., None], axis=-1)[..., 0]
    return jnp.mean(nll)


# ------------------------------------ main ---------------------------------------
if __name__ == "__main__":
    key = jax.random.PRNGKey(0)
    ks = jax.random.split(key, 12)

    def u(k, shape, scale=0.25):
        return jax.random.uniform(k, shape, jnp.float32, -scale, scale)

    params = {
        'word_emb': jax.random.normal(ks[0], (V, E), jnp.float32) * 0.5,
        'wih_f': u(ks[1], (E, 4 * H)), 'whh_f': u(ks[2], (H, 4 * H)),
        'b_f':   u(ks[3], (1, 4 * H)),
        'wih_b': u(ks[4], (E, 4 * H)), 'whh_b': u(ks[5], (H, 4 * H)),
        'b_b':   u(ks[6], (1, 4 * H)),
        'wcls':  u(ks[7], (D, C)),     'bcls':  u(ks[8], (1, C)),
    }

    tokens = jax.random.randint(ks[9], (B, T), 0, V, dtype=jnp.int32)
    labels = jax.random.randint(ks[10], (B, T), 0, C, dtype=jnp.int32)
    # variable-length sequences; max length == T so padded lengths line up
    masks = jnp.array([[1] * T,
                       [1] * 5 + [0] * (T - 5)], dtype=jnp.int32)

    loss = jax.block_until_ready(
        jax.jit(ner_loss_pallas)(tokens, masks, labels, params))
    ref = jax.block_until_ready(
        jax.jit(ner_loss_reference)(tokens, masks, labels, params))

    assert jnp.isfinite(loss), "non-finite loss"
    # f32 end-to-end -> tight tolerance (catches gate-order / masking / packing bugs)
    assert abs(float(loss) - float(ref)) < 1e-3, (float(loss), float(ref))
    print("KERNEL_OK")
</pallas_src>

<mosaic_0001>
module attributes {stable_mosaic.version = 11 : i64} {
  func.func @ner_loss_kernel(%arg0: memref<64x128xf32, #tpu.memory_space<vmem>>, %arg1: memref<64x128xf32, #tpu.memory_space<vmem>>, %arg2: memref<64x128xf32, #tpu.memory_space<vmem>>, %arg3: memref<128x512xf32, #tpu.memory_space<vmem>>, %arg4: memref<1x512xf32, #tpu.memory_space<vmem>>, %arg5: memref<128x512xf32, #tpu.memory_space<vmem>>, %arg6: memref<256x128xf32, #tpu.memory_space<vmem>>, %arg7: memref<1x128xf32, #tpu.memory_space<vmem>>, %arg8: memref<1x1xf32, #tpu.memory_space<vmem>>, %arg9: memref<64x512xf32, #tpu.memory_space<vmem>>, %arg10: memref<64x256xf32, #tpu.memory_space<vmem>>) attributes {dimension_semantics = [], scalar_prefetch = 0 : i64, scratch_operands = 2 : i64, tpu.core_type = #tpu.core_type<tc>} {
    %c0 = arith.constant 0 : index
    %c0_0 = arith.constant 0 : index
    %0 = vector.load %arg0[%c0, %c0_0] : memref<64x128xf32, #tpu.memory_space<vmem>>, vector<64x128xf32>
    %c0_1 = arith.constant 0 : index
    %c0_2 = arith.constant 0 : index
    %1 = vector.load %arg3[%c0_1, %c0_2] : memref<128x512xf32, #tpu.memory_space<vmem>>, vector<128x512xf32>
    %cst = arith.constant dense<0.000000e+00> : vector<64x512xf32>
    %2 = tpu.matmul %0, %1, %cst {dimension_numbers = #tpu.dot_dimension_numbers<[1], [0], [0], [1], [0, 0, 1, 1], [], []>} : vector<64x128xf32>, vector<128x512xf32>, vector<64x512xf32> -> vector<64x512xf32>
    %c0_3 = arith.constant 0 : index
    %c0_4 = arith.constant 0 : index
    %3 = vector.load %arg4[%c0_3, %c0_4] : memref<1x512xf32, #tpu.memory_space<vmem>>, vector<1x512xf32>
    %4 = vector.broadcast %3 : vector<1x512xf32> to vector<64x512xf32>
    %5 = arith.addf %2, %4 : vector<64x512xf32>
    %c0_5 = arith.constant 0 : index
    %c0_6 = arith.constant 0 : index
    %6 = vector.load %arg9[%c0_5, %c0_6] : memref<64x512xf32, #tpu.memory_space<vmem>>, vector<64x512xf32>
    tpu.vector_store %arg9[%c0_5, %c0_6], %5 {strides = array<i32>} : memref<64x512xf32, #tpu.memory_space<vmem>>, vector<64x512xf32>,
    %cst_7 = arith.constant 0.000000e+00 : f32
    %7 = vector.broadcast %cst_7 : f32 to vector<8x128xf32>
    %cst_8 = arith.constant 0.000000e+00 : f32
    %8 = vector.broadcast %cst_8 : f32 to vector<8x128xf32>
    %c0_9 = arith.constant 0 : index
    %c0_10 = arith.constant 0 : index
    %9 = vector.load %arg9[%c0_9, %c0_10] : memref<64x512xf32, #tpu.memory_space<vmem>>, vector<8x512xf32>
    %c0_11 = arith.constant 0 : index
    %c0_12 = arith.constant 0 : index
    %10 = vector.load %arg5[%c0_11, %c0_12] : memref<128x512xf32, #tpu.memory_space<vmem>>, vector<128x512xf32>
    %cst_13 = arith.constant dense<0.000000e+00> : vector<8x512xf32>
    %11 = tpu.matmul %7, %10, %cst_13 {dimension_numbers = #tpu.dot_dimension_numbers<[1], [0], [0], [1], [0, 0, 1, 1], [], []>} : vector<8x128xf32>, vector<128x512xf32>, vector<8x512xf32> -> vector<8x512xf32>
    %12 = arith.addf %9, %11 : vector<8x512xf32>
    %13 = vector.extract_strided_slice %12 {offsets = [0, 0], sizes = [8, 128], strides = [1, 1]} : vector<8x512xf32> to vector<8x128xf32>
    %14 = arith.negf %13 : vector<8x128xf32>
    %15 = math.exp %14 : vector<8x128xf32>
    %cst_14 = arith.constant 1.000000e+00 : f32
    %16 = vector.broadcast %cst_14 : f32 to vector<8x128xf32>
    %17 = arith.addf %16, %15 : vector<8x128xf32>
    %18 = arith.divf %16, %17 : vector<8x128xf32>
    %19 = vector.extract_strided_slice %12 {offsets = [0, 128], sizes = [8, 128], strides = [1, 1]} : vector<8x512xf32> to vector<8x128xf32>
    %20 = arith.negf %19 : vector<8x128xf32>
    %21 = math.exp %20 : vector<8x128xf32>
    %cst_15 = arith.constant 1.000000e+00 : f32
    %22 = vector.broadcast %cst_15 : f32 to vector<8x128xf32>
    %23 = arith.addf %22, %21 : vector<8x128xf32>
    %24 = arith.divf %22, %23 : vector<8x128xf32>
    %25 = vector.extract_strided_slice %12 {offsets = [0, 256], sizes = [8, 128], strides = [1, 1]} : vector<8x512xf32> to vector<8x128xf32>
    %26 = math.tanh %25 : vector<8x128xf32>
    %27 = vector.extract_strided_slice %12 {offsets = [0, 384], sizes = [8, 128], strides = [1, 1]} : vector<8x512xf32> to vector<8x128xf32>
    %28 = arith.negf %27 : vector<8x128xf32>
    %29 = math.exp %28 : vector<8x128xf32>
    %cst_16 = arith.constant 1.000000e+00 : f32
    %30 = vector.broadcast %cst_16 : f32 to vector<8x128xf32>
    %31 = arith.addf %30, %29 : vector<8x128xf32>
    %32 = arith.divf %30, %31 : vector<8x128xf32>
    %33 = arith.mulf %24, %8 : vector<8x128xf32>
    %34 = arith.mulf %18, %26 : vector<8x128xf32>
    %35 = arith.addf %33, %34 : vector<8x128xf32>
    %36 = math.tanh %35 : vector<8x128xf32>
    %37 = arith.mulf %32, %36 : vector<8x128xf32>
    %c0_17 = arith.constant 0 : index
    %c0_18 = arith.constant 0 : index
    %38 = vector.load %arg1[%c0_17, %c0_18] : memref<64x128xf32, #tpu.memory_space<vmem>>, vector<8x128xf32>
    %cst_19 = arith.constant 0.000000e+00 : f32
    %39 = vector.broadcast %cst_19 : f32 to vector<8x128xf32>
    %40 = arith.cmpf ogt, %38, %39 : vector<8x128xf32>
    %41 = arith.select %40, %37, %7 : vector<8x128xi1>, vector<8x128xf32>
    %42 = arith.select %40, %35, %8 : vector<8x128xi1>, vector<8x128xf32>
    %cst_20 = arith.constant 0.000000e+00 : f32
    %43 = vector.broadcast %cst_20 : f32 to vector<8x128xf32>
    %44 = arith.select %40, %37, %43 : vector<8x128xi1>, vector<8x128xf32>
    %c0_21 = arith.constant 0 : index
    %c0_22 = arith.constant 0 : index
    %45 = vector.load %arg10[%c0_21, %c0_22] : memref<64x256xf32, #tpu.memory_space<vmem>>, vector<8x128xf32>
    tpu.vector_store %arg10[%c0_21, %c0_22], %44 {strides = array<i32>} : memref<64x256xf32, #tpu.memory_space<vmem>>, vector<8x128xf32>,
    %c56 = arith.constant 56 : index
    %c128 = arith.constant 128 : index
    %46 = vector.load %arg10[%c56, %c128] : memref<64x256xf32, #tpu.memory_space<vmem>>, vector<8x128xf32>
    tpu.vector_store %arg10[%c56, %c128], %44 {strides = array<i32>} : memref<64x256xf32, #tpu.memory_space<vmem>>, vector<8x128xf32>,
    %c8 = arith.constant 8 : index
    %c0_23 = arith.constant 0 : index
    %47 = vector.load %arg9[%c8, %c0_23] : memref<64x512xf32, #tpu.memory_space<vmem>>, vector<8x512xf32>
    %c0_24 = arith.constant 0 : index
    %c0_25 = arith.constant 0 : index
    %48 = vector.load %arg5[%c0_24, %c0_25] : memref<128x512xf32, #tpu.memory_space<vmem>>, vector<128x512xf32>
    %cst_26 = arith.constant dense<0.000000e+00> : vector<8x512xf32>
    %49 = tpu.matmul %41, %48, %cst_26 {dimension_numbers = #tpu.dot_dimension_numbers<[1], [0], [0], [1], [0, 0, 1, 1], [], []>} : vector<8x128xf32>, vector<128x512xf32>, vector<8x512xf32> -> vector<8x512xf32>
    %50 = arith.addf %47, %49 : vector<8x512xf32>
    %51 = vector.extract_strided_slice %50 {offsets = [0, 0], sizes = [8, 128], strides = [1, 1]} : vector<8x512xf32> to vector<8x128xf32>
    %52 = arith.negf %51 : vector<8x128xf32>
    %53 = math.exp %52 : vector<8x128xf32>
    %cst_27 = arith.constant 1.000000e+00 : f32
    %54 = vector.broadcast %cst_27 : f32 to vector<8x128xf32>
    %55 = arith.addf %54, %53 : vector<8x128xf32>
    %56 = arith.divf %54, %55 : vector<8x128xf32>
    %57 = vector.extract_strided_slice %50 {offsets = [0, 128], sizes = [8, 128], strides = [1, 1]} : vector<8x512xf32> to vector<8x128xf32>
    %58 = arith.negf %57 : vector<8x128xf32>
    %59 = math.exp %58 : vector<8x128xf32>
    %cst_28 = arith.constant 1.000000e+00 : f32
    %60 = vector.broadcast %cst_28 : f32 to vector<8x128xf32>
    %61 = arith.addf %60, %59 : vector<8x128xf32>
    %62 = arith.divf %60, %61 : vector<8x128xf32>
    %63 = vector.extract_strided_slice %50 {offsets = [0, 256], sizes = [8, 128], strides = [1, 1]} : vector<8x512xf32> to vector<8x128xf32>
    %64 = math.tanh %63 : vector<8x128xf32>
    %65 = vector.extract_strided_slice %50 {offsets = [0, 384], sizes = [8, 128], strides = [1, 1]} : vector<8x512xf32> to vector<8x128xf32>
    %66 = arith.negf %65 : vector<8x128xf32>
    %67 = math.exp %66 : vector<8x128xf32>
    %cst_29 = arith.constant 1.000000e+00 : f32
    %68 = vector.broadcast %cst_29 : f32 to vector<8x128xf32>
    %69 = arith.addf %68, %67 : vector<8x128xf32>
    %70 = arith.divf %68, %69 : vector<8x128xf32>
    %71 = arith.mulf %62, %42 : vector<8x128xf32>
    %72 = arith.mulf %56, %64 : vector<8x128xf32>
    %73 = arith.addf %71, %72 : vector<8x128xf32>
    %74 = math.tanh %73 : vector<8x128xf32>
    %75 = arith.mulf %70, %74 : vector<8x128xf32>
    %c8_30 = arith.constant 8 : index
    %c0_31 = arith.constant 0 : index
    %76 = vector.load %arg1[%c8_30, %c0_31] : memref<64x128xf32, #tpu.memory_space<vmem>>, vector<8x128xf32>
    %cst_32 = arith.constant 0.000000e+00 : f32
    %77 = vector.broadcast %cst_32 : f32 to vector<8x128xf32>
    %78 = arith.cmpf ogt, %76, %77 : vector<8x128xf32>
    %79 = arith.select %78, %75, %41 : vector<8x128xi1>, vector<8x128xf32>
    %80 = arith.select %78, %73, %42 : vector<8x128xi1>, vector<8x128xf32>
    %cst_33 = arith.constant 0.000000e+00 : f32
    %81 = vector.broadcast %cst_33 : f32 to vector<8x128xf32>
    %82 = arith.select %78, %75, %81 : vector<8x128xi1>, vector<8x128xf32>
    %c8_34 = arith.constant 8 : index
    %c0_35 = arith.constant 0 : index
    %83 = vector.load %arg10[%c8_34, %c0_35] : memref<64x256xf32, #tpu.memory_space<vmem>>, vector<8x128xf32>
    tpu.vector_store %arg10[%c8_34, %c0_35], %82 {strides = array<i32>} : memref<64x256xf32, #tpu.memory_space<vmem>>, vector<8x128xf32>,
    %c48 = arith.constant 48 : index
    %c128_36 = arith.constant 128 : index
    %84 = vector.load %arg10[%c48, %c128_36] : memref<64x256xf32, #tpu.memory_space<vmem>>, vector<8x128xf32>
    tpu.vector_store %arg10[%c48, %c128_36], %82 {strides = array<i32>} : memref<64x256xf32, #tpu.memory_space<vmem>>, vector<8x128xf32>,
    %c16 = arith.constant 16 : index
    %c0_37 = arith.constant 0 : index
    %85 = vector.load %arg9[%c16, %c0_37] : memref<64x512xf32, #tpu.memory_space<vmem>>, vector<8x512xf32>
    %c0_38 = arith.constant 0 : index
    %c0_39 = arith.constant 0 : index
    %86 = vector.load %arg5[%c0_38, %c0_39] : memref<128x512xf32, #tpu.memory_space<vmem>>, vector<128x512xf32>
    %cst_40 = arith.constant dense<0.000000e+00> : vector<8x512xf32>
    %87 = tpu.matmul %79, %86, %cst_40 {dimension_numbers = #tpu.dot_dimension_numbers<[1], [0], [0], [1], [0, 0, 1, 1], [], []>} : vector<8x128xf32>, vector<128x512xf32>, vector<8x512xf32> -> vector<8x512xf32>
    %88 = arith.addf %85, %87 : vector<8x512xf32>
    %89 = vector.extract_strided_slice %88 {offsets = [0, 0], sizes = [8, 128], strides = [1, 1]} : vector<8x512xf32> to vector<8x128xf32>
    %90 = arith.negf %89 : vector<8x128xf32>
    %91 = math.exp %90 : vector<8x128xf32>
    %cst_41 = arith.constant 1.000000e+00 : f32
    %92 = vector.broadcast %cst_41 : f32 to vector<8x128xf32>
    %93 = arith.addf %92, %91 : vector<8x128xf32>
    %94 = arith.divf %92, %93 : vector<8x128xf32>
    %95 = vector.extract_strided_slice %88 {offsets = [0, 128], sizes = [8, 128], strides = [1, 1]} : vector<8x512xf32> to vector<8x128xf32>
    %96 = arith.negf %95 : vector<8x128xf32>
    %97 = math.exp %96 : vector<8x128xf32>
    %cst_42 = arith.constant 1.000000e+00 : f32
    %98 = vector.broadcast %cst_42 : f32 to vector<8x128xf32>
    %99 = arith.addf %98, %97 : vector<8x128xf32>
    %100 = arith.divf %98, %99 : vector<8x128xf32>
    %101 = vector.extract_strided_slice %88 {offsets = [0, 256], sizes = [8, 128], strides = [1, 1]} : vector<8x512xf32> to vector<8x128xf32>
    %102 = math.tanh %101 : vector<8x128xf32>
    %103 = vector.extract_strided_slice %88 {offsets = [0, 384], sizes = [8, 128], strides = [1, 1]} : vector<8x512xf32> to vector<8x128xf32>
    %104 = arith.negf %103 : vector<8x128xf32>
    %105 = math.exp %104 : vector<8x128xf32>
    %cst_43 = arith.constant 1.000000e+00 : f32
    %106 = vector.broadcast %cst_43 : f32 to vector<8x128xf32>
    %107 = arith.addf %106, %105 : vector<8x128xf32>
    %108 = arith.divf %106, %107 : vector<8x128xf32>
    %109 = arith.mulf %100, %80 : vector<8x128xf32>
    %110 = arith.mulf %94, %102 : vector<8x128xf32>
    %111 = arith.addf %109, %110 : vector<8x128xf32>
    %112 = math.tanh %111 : vector<8x128xf32>
    %113 = arith.mulf %108, %112 : vector<8x128xf32>
    %c16_44 = arith.constant 16 : index
    %c0_45 = arith.constant 0 : index
    %114 = vector.load %arg1[%c16_44, %c0_45] : memref<64x128xf32, #tpu.memory_space<vmem>>, vector<8x128xf32>
    %cst_46 = arith.constant 0.000000e+00 : f32
    %115 = vector.broadcast %cst_46 : f32 to vector<8x128xf32>
    %116 = arith.cmpf ogt, %114, %115 : vector<8x128xf32>
    %117 = arith.select %116, %113, %79 : vector<8x128xi1>, vector<8x128xf32>
    %118 = arith.select %116, %111, %80 : vector<8x128xi1>, vector<8x128xf32>
    %cst_47 = arith.constant 0.000000e+00 : f32
    %119 = vector.broadcast %cst_47 : f32 to vector<8x128xf32>
    %120 = arith.select %116, %113, %119 : vector<8x128xi1>, vector<8x128xf32>
    %c16_48 = arith.constant 16 : index
    %c0_49 = arith.constant 0 : index
    %121 = vector.load %arg10[%c16_48, %c0_49] : memref<64x256xf32, #tpu.memory_space<vmem>>, vector<8x128xf32>
    tpu.vector_store %arg10[%c16_48, %c0_49], %120 {strides = array<i32>} : memref<64x256xf32, #tpu.memory_space<vmem>>, vector<8x128xf32>,
    %c40 = arith.constant 40 : index
    %c128_50 = arith.constant 128 : index
    %122 = vector.load %arg10[%c40, %c128_50] : memref<64x256xf32, #tpu.memory_space<vmem>>, vector<8x128xf32>
    tpu.vector_store %arg10[%c40, %c128_50], %120 {strides = array<i32>} : memref<64x256xf32, #tpu.memory_space<vmem>>, vector<8x128xf32>,
    %c24 = arith.constant 24 : index
    %c0_51 = arith.constant 0 : index
    %123 = vector.load %arg9[%c24, %c0_51] : memref<64x512xf32, #tpu.memory_space<vmem>>, vector<8x512xf32>
    %c0_52 = arith.constant 0 : index
    %c0_53 = arith.constant 0 : index
    %124 = vector.load %arg5[%c0_52, %c0_53] : memref<128x512xf32, #tpu.memory_space<vmem>>, vector<128x512xf32>
    %cst_54 = arith.constant dense<0.000000e+00> : vector<8x512xf32>
    %125 = tpu.matmul %117, %124, %cst_54 {dimension_numbers = #tpu.dot_dimension_numbers<[1], [0], [0], [1], [0, 0, 1, 1], [], []>} : vector<8x128xf32>, vector<128x512xf32>, vector<8x512xf32> -> vector<8x512xf32>
    %126 = arith.addf %123, %125 : vector<8x512xf32>
    %127 = vector.extract_strided_slice %126 {offsets = [0, 0], sizes = [8, 128], strides = [1, 1]} : vector<8x512xf32> to vector<8x128xf32>
    %128 = arith.negf %127 : vector<8x128xf32>
    %129 = math.exp %128 : vector<8x128xf32>
    %cst_55 = arith.constant 1.000000e+00 : f32
    %130 = vector.broadcast %cst_55 : f32 to vector<8x128xf32>
    %131 = arith.addf %130, %129 : vector<8x128xf32>
    %132 = arith.divf %130, %131 : vector<8x128xf32>
    %133 = vector.extract_strided_slice %126 {offsets = [0, 128], sizes = [8, 128], strides = [1, 1]} : vector<8x512xf32> to vector<8x128xf32>
    %134 = arith.negf %133 : vector<8x128xf32>
    %135 = math.exp %134 : vector<8x128xf32>
    %cst_56 = arith.constant 1.000000e+00 : f32
    %136 = vector.broadcast %cst_56 : f32 to vector<8x128xf32>
    %137 = arith.addf %136, %135 : vector<8x128xf32>
    %138 = arith.divf %136, %137 : vector<8x128xf32>
    %139 = vector.extract_strided_slice %126 {offsets = [0, 256], sizes = [8, 128], strides = [1, 1]} : vector<8x512xf32> to vector<8x128xf32>
    %140 = math.tanh %139 : vector<8x128xf32>
    %141 = vector.extract_strided_slice %126 {offsets = [0, 384], sizes = [8, 128], strides = [1, 1]} : vector<8x512xf32> to vector<8x128xf32>
    %142 = arith.negf %141 : vector<8x128xf32>
    %143 = math.exp %142 : vector<8x128xf32>
    %cst_57 = arith.constant 1.000000e+00 : f32
    %144 = vector.broadcast %cst_57 : f32 to vector<8x128xf32>
    %145 = arith.addf %144, %143 : vector<8x128xf32>
    %146 = arith.divf %144, %145 : vector<8x128xf32>
    %147 = arith.mulf %138, %118 : vector<8x128xf32>
    %148 = arith.mulf %132, %140 : vector<8x128xf32>
    %149 = arith.addf %147, %148 : vector<8x128xf32>
    %150 = math.tanh %149 : vector<8x128xf32>
    %151 = arith.mulf %146, %150 : vector<8x128xf32>
    %c24_58 = arith.constant 24 : index
    %c0_59 = arith.constant 0 : index
    %152 = vector.load %arg1[%c24_58, %c0_59] : memref<64x128xf32, #tpu.memory_space<vmem>>, vector<8x128xf32>
    %cst_60 = arith.constant 0.000000e+00 : f32
    %153 = vector.broadcast %cst_60 : f32 to vector<8x128xf32>
    %154 = arith.cmpf ogt, %152, %153 : vector<8x128xf32>
    %155 = arith.select %154, %151, %117 : vector<8x128xi1>, vector<8x128xf32>
    %156 = arith.select %154, %149, %118 : vector<8x128xi1>, vector<8x128xf32>
    %cst_61 = arith.constant 0.000000e+00 : f32
    %157 = vector.broadcast %cst_61 : f32 to vector<8x128xf32>
    %158 = arith.select %154, %151, %157 : vector<8x128xi1>, vector<8x128xf32>
    %c24_62 = arith.constant 24 : index
    %c0_63 = arith.constant 0 : index
    %159 = vector.load %arg10[%c24_62, %c0_63] : memref<64x256xf32, #tpu.memory_space<vmem>>, vector<8x128xf32>
    tpu.vector_store %arg10[%c24_62, %c0_63], %158 {strides = array<i32>} : memref<64x256xf32, #tpu.memory_space<vmem>>, vector<8x128xf32>,
    %c32 = arith.constant 32 : index
    %c128_64 = arith.constant 128 : index
    %160 = vector.load %arg10[%c32, %c128_64] : memref<64x256xf32, #tpu.memory_space<vmem>>, vector<8x128xf32>
    tpu.vector_store %arg10[%c32, %c128_64], %158 {strides = array<i32>} : memref<64x256xf32, #tpu.memory_space<vmem>>, vector<8x128xf32>,
    %c32_65 = arith.constant 32 : index
    %c0_66 = arith.constant 0 : index
    %161 = vector.load %arg9[%c32_65, %c0_66] : memref<64x512xf32, #tpu.memory_space<vmem>>, vector<8x512xf32>
    %c0_67 = arith.constant 0 : index
    %c0_68 = arith.constant 0 : index
    %162 = vector.load %arg5[%c0_67, %c0_68] : memref<128x512xf32, #tpu.memory_space<vmem>>, vector<128x512xf32>
    %cst_69 = arith.constant dense<0.000000e+00> : vector<8x512xf32>
    %163 = tpu.matmul %155, %162, %cst_69 {dimension_numbers = #tpu.dot_dimension_numbers<[1], [0], [0], [1], [0, 0, 1, 1], [], []>} : vector<8x128xf32>, vector<128x512xf32>, vector<8x512xf32> -> vector<8x512xf32>
    %164 = arith.addf %161, %163 : vector<8x512xf32>
    %165 = vector.extract_strided_slice %164 {offsets = [0, 0], sizes = [8, 128], strides = [1, 1]} : vector<8x512xf32> to vector<8x128xf32>
    %166 = arith.negf %165 : vector<8x128xf32>
    %167 = math.exp %166 : vector<8x128xf32>
    %cst_70 = arith.constant 1.000000e+00 : f32
    %168 = vector.broadcast %cst_70 : f32 to vector<8x128xf32>
    %169 = arith.addf %168, %167 : vector<8x128xf32>
    %170 = arith.divf %168, %169 : vector<8x128xf32>
    %171 = vector.extract_strided_slice %164 {offsets = [0, 128], sizes = [8, 128], strides = [1, 1]} : vector<8x512xf32> to vector<8x128xf32>
    %172 = arith.negf %171 : vector<8x128xf32>
    %173 = math.exp %172 : vector<8x128xf32>
    %cst_71 = arith.constant 1.000000e+00 : f32
    %174 = vector.broadcast %cst_71 : f32 to vector<8x128xf32>
    %175 = arith.addf %174, %173 : vector<8x128xf32>
    %176 = arith.divf %174, %175 : vector<8x128xf32>
    %177 = vector.extract_strided_slice %164 {offsets = [0, 256], sizes = [8, 128], strides = [1, 1]} : vector<8x512xf32> to vector<8x128xf32>
    %178 = math.tanh %177 : vector<8x128xf32>
    %179 = vector.extract_strided_slice %164 {offsets = [0, 384], sizes = [8, 128], strides = [1, 1]} : vector<8x512xf32> to vector<8x128xf32>
    %180 = arith.negf %179 : vector<8x128xf32>
    %181 = math.exp %180 : vector<8x128xf32>
    %cst_72 = arith.constant 1.000000e+00 : f32
    %182 = vector.broadcast %cst_72 : f32 to vector<8x128xf32>
    %183 = arith.addf %182, %181 : vector<8x128xf32>
    %184 = arith.divf %182, %183 : vector<8x128xf32>
    %185 = arith.mulf %176, %156 : vector<8x128xf32>
    %186 = arith.mulf %170, %178 : vector<8x128xf32>
    %187 = arith.addf %185, %186 : vector<8x128xf32>
    %188 = math.tanh %187 : vector<8x128xf32>
    %189 = arith.mulf %184, %188 : vector<8x128xf32>
    %c32_73 = arith.constant 32 : index
    %c0_74 = arith.constant 0 : index
    %190 = vector.load %arg1[%c32_73, %c0_74] : memref<64x128xf32, #tpu.memory_space<vmem>>, vector<8x128xf32>
    %cst_75 = arith.constant 0.000000e+00 : f32
    %191 = vector.broadcast %cst_75 : f32 to vector<8x128xf32>
    %192 = arith.cmpf ogt, %190, %191 : vector<8x128xf32>
    %193 = arith.select %192, %189, %155 : vector<8x128xi1>, vector<8x128xf32>
    %194 = arith.select %192, %187, %156 : vector<8x128xi1>, vector<8x128xf32>
    %cst_76 = arith.constant 0.000000e+00 : f32
    %195 = vector.broadcast %cst_76 : f32 to vector<8x128xf32>
    %196 = arith.select %192, %189, %195 : vector<8x128xi1>, vector<8x128xf32>
    %c32_77 = arith.constant 32 : index
    %c0_78 = arith.constant 0 : index
    %197 = vector.load %arg10[%c32_77, %c0_78] : memref<64x256xf32, #tpu.memory_space<vmem>>, vector<8x128xf32>
    tpu.vector_store %arg10[%c32_77, %c0_78], %196 {strides = array<i32>} : memref<64x256xf32, #tpu.memory_space<vmem>>, vector<8x128xf32>,
    %c24_79 = arith.constant 24 : index
    %c128_80 = arith.constant 128 : index
    %198 = vector.load %arg10[%c24_79, %c128_80] : memref<64x256xf32, #tpu.memory_space<vmem>>, vector<8x128xf32>
    tpu.vector_store %arg10[%c24_79, %c128_80], %196 {strides = array<i32>} : memref<64x256xf32, #tpu.memory_space<vmem>>, vector<8x128xf32>,
    %c40_81 = arith.constant 40 : index
    %c0_82 = arith.constant 0 : index
    %199 = vector.load %arg9[%c40_81, %c0_82] : memref<64x512xf32, #tpu.memory_space<vmem>>, vector<8x512xf32>
    %c0_83 = arith.constant 0 : index
    %c0_84 = arith.constant 0 : index
    %200 = vector.load %arg5[%c0_83, %c0_84] : memref<128x512xf32, #tpu.memory_space<vmem>>, vector<128x512xf32>
    %cst_85 = arith.constant dense<0.000000e+00> : vector<8x512xf32>
    %201 = tpu.matmul %193, %200, %cst_85 {dimension_numbers = #tpu.dot_dimension_numbers<[1], [0], [0], [1], [0, 0, 1, 1], [], []>} : vector<8x128xf32>, vector<128x512xf32>, vector<8x512xf32> -> vector<8x512xf32>
    %202 = arith.addf %199, %201 : vector<8x512xf32>
    %203 = vector.extract_strided_slice %202 {offsets = [0, 0], sizes = [8, 128], strides = [1, 1]} : vector<8x512xf32> to vector<8x128xf32>
    %204 = arith.negf %203 : vector<8x128xf32>
    %205 = math.exp %204 : vector<8x128xf32>
    %cst_86 = arith.constant 1.000000e+00 : f32
    %206 = vector.broadcast %cst_86 : f32 to vector<8x128xf32>
    %207 = arith.addf %206, %205 : vector<8x128xf32>
    %208 = arith.divf %206, %207 : vector<8x128xf32>
    %209 = vector.extract_strided_slice %202 {offsets = [0, 128], sizes = [8, 128], strides = [1, 1]} : vector<8x512xf32> to vector<8x128xf32>
    %210 = arith.negf %209 : vector<8x128xf32>
    %211 = math.exp %210 : vector<8x128xf32>
    %cst_87 = arith.constant 1.000000e+00 : f32
    %212 = vector.broadcast %cst_87 : f32 to vector<8x128xf32>
    %213 = arith.addf %212, %211 : vector<8x128xf32>
    %214 = arith.divf %212, %213 : vector<8x128xf32>
    %215 = vector.extract_strided_slice %202 {offsets = [0, 256], sizes = [8, 128], strides = [1, 1]} : vector<8x512xf32> to vector<8x128xf32>
    %216 = math.tanh %215 : vector<8x128xf32>
    %217 = vector.extract_strided_slice %202 {offsets = [0, 384], sizes = [8, 128], strides = [1, 1]} : vector<8x512xf32> to vector<8x128xf32>
    %218 = arith.negf %217 : vector<8x128xf32>
    %219 = math.exp %218 : vector<8x128xf32>
    %cst_88 = arith.constant 1.000000e+00 : f32
    %220 = vector.broadcast %cst_88 : f32 to vector<8x128xf32>
    %221 = arith.addf %220, %219 : vector<8x128xf32>
    %222 = arith.divf %220, %221 : vector<8x128xf32>
    %223 = arith.mulf %214, %194 : vector<8x128xf32>
    %224 = arith.mulf %208, %216 : vector<8x128xf32>
    %225 = arith.addf %223, %224 : vector<8x128xf32>
    %226 = math.tanh %225 : vector<8x128xf32>
    %227 = arith.mulf %222, %226 : vector<8x128xf32>
    %c40_89 = arith.constant 40 : index
    %c0_90 = arith.constant 0 : index
    %228 = vector.load %arg1[%c40_89, %c0_90] : memref<64x128xf32, #tpu.memory_space<vmem>>, vector<8x128xf32>
    %cst_91 = arith.constant 0.000000e+00 : f32
    %229 = vector.broadcast %cst_91 : f32 to vector<8x128xf32>
    %230 = arith.cmpf ogt, %228, %229 : vector<8x128xf32>
    %231 = arith.select %230, %227, %193 : vector<8x128xi1>, vector<8x128xf32>
    %232 = arith.select %230, %225, %194 : vector<8x128xi1>, vector<8x128xf32>
    %cst_92 = arith.constant 0.000000e+00 : f32
    %233 = vector.broadcast %cst_92 : f32 to vector<8x128xf32>
    %234 = arith.select %230, %227, %233 : vector<8x128xi1>, vector<8x128xf32>
    %c40_93 = arith.constant 40 : index
    %c0_94 = arith.constant 0 : index
    %235 = vector.load %arg10[%c40_93, %c0_94] : memref<64x256xf32, #tpu.memory_space<vmem>>, vector<8x128xf32>
    tpu.vector_store %arg10[%c40_93, %c0_94], %234 {strides = array<i32>} : memref<64x256xf32, #tpu.memory_space<vmem>>, vector<8x128xf32>,
    %c16_95 = arith.constant 16 : index
    %c128_96 = arith.constant 128 : index
    %236 = vector.load %arg10[%c16_95, %c128_96] : memref<64x256xf32, #tpu.memory_space<vmem>>, vector<8x128xf32>
    tpu.vector_store %arg10[%c16_95, %c128_96], %234 {strides = array<i32>} : memref<64x256xf32, #tpu.memory_space<vmem>>, vector<8x128xf32>,
    %c48_97 = arith.constant 48 : index
    %c0_98 = arith.constant 0 : index
    %237 = vector.load %arg9[%c48_97, %c0_98] : memref<64x512xf32, #tpu.memory_space<vmem>>, vector<8x512xf32>
    %c0_99 = arith.constant 0 : index
    %c0_100 = arith.constant 0 : index
    %238 = vector.load %arg5[%c0_99, %c0_100] : memref<128x512xf32, #tpu.memory_space<vmem>>, vector<128x512xf32>
    %cst_101 = arith.constant dense<0.000000e+00> : vector<8x512xf32>
    %239 = tpu.matmul %231, %238, %cst_101 {dimension_numbers = #tpu.dot_dimension_numbers<[1], [0], [0], [1], [0, 0, 1, 1], [], []>} : vector<8x128xf32>, vector<128x512xf32>, vector<8x512xf32> -> vector<8x512xf32>
    %240 = arith.addf %237, %239 : vector<8x512xf32>
    %241 = vector.extract_strided_slice %240 {offsets = [0, 0], sizes = [8, 128], strides = [1, 1]} : vector<8x512xf32> to vector<8x128xf32>
    %242 = arith.negf %241 : vector<8x128xf32>
    %243 = math.exp %242 : vector<8x128xf32>
    %cst_102 = arith.constant 1.000000e+00 : f32
    %244 = vector.broadcast %cst_102 : f32 to vector<8x128xf32>
    %245 = arith.addf %244, %243 : vector<8x128xf32>
    %246 = arith.divf %244, %245 : vector<8x128xf32>
    %247 = vector.extract_strided_slice %240 {offsets = [0, 128], sizes = [8, 128], strides = [1, 1]} : vector<8x512xf32> to vector<8x128xf32>
    %248 = arith.negf %247 : vector<8x128xf32>
    %249 = math.exp %248 : vector<8x128xf32>
    %cst_103 = arith.constant 1.000000e+00 : f32
    %250 = vector.broadcast %cst_103 : f32 to vector<8x128xf32>
    %251 = arith.addf %250, %249 : vector<8x128xf32>
    %252 = arith.divf %250, %251 : vector<8x128xf32>
    %253 = vector.extract_strided_slice %240 {offsets = [0, 256], sizes = [8, 128], strides = [1, 1]} : vector<8x512xf32> to vector<8x128xf32>
    %254 = math.tanh %253 : vector<8x128xf32>
    %255 = vector.extract_strided_slice %240 {offsets = [0, 384], sizes = [8, 128], strides = [1, 1]} : vector<8x512xf32> to vector<8x128xf32>
    %256 = arith.negf %255 : vector<8x128xf32>
    %257 = math.exp %256 : vector<8x128xf32>
    %cst_104 = arith.constant 1.000000e+00 : f32
    %258 = vector.broadcast %cst_104 : f32 to vector<8x128xf32>
    %259 = arith.addf %258, %257 : vector<8x128xf32>
    %260 = arith.divf %258, %259 : vector<8x128xf32>
    %261 = arith.mulf %252, %232 : vector<8x128xf32>
    %262 = arith.mulf %246, %254 : vector<8x128xf32>
    %263 = arith.addf %261, %262 : vector<8x128xf32>
    %264 = math.tanh %263 : vector<8x128xf32>
    %265 = arith.mulf %260, %264 : vector<8x128xf32>
    %c48_105 = arith.constant 48 : index
    %c0_106 = arith.constant 0 : index
    %266 = vector.load %arg1[%c48_105, %c0_106] : memref<64x128xf32, #tpu.memory_space<vmem>>, vector<8x128xf32>
    %cst_107 = arith.constant 0.000000e+00 : f32
    %267 = vector.broadcast %cst_107 : f32 to vector<8x128xf32>
    %268 = arith.cmpf ogt, %266, %267 : vector<8x128xf32>
    %269 = arith.select %268, %265, %231 : vector<8x128xi1>, vector<8x128xf32>
    %270 = arith.select %268, %263, %232 : vector<8x128xi1>, vector<8x128xf32>
    %cst_108 = arith.constant 0.000000e+00 : f32
    %271 = vector.broadcast %cst_108 : f32 to vector<8x128xf32>
    %272 = arith.select %268, %265, %271 : vector<8x128xi1>, vector<8x128xf32>
    %c48_109 = arith.constant 48 : index
    %c0_110 = arith.constant 0 : index
    %273 = vector.load %arg10[%c48_109, %c0_110] : memref<64x256xf32, #tpu.memory_space<vmem>>, vector<8x128xf32>
    tpu.vector_store %arg10[%c48_109, %c0_110], %272 {strides = array<i32>} : memref<64x256xf32, #tpu.memory_space<vmem>>, vector<8x128xf32>,
    %c8_111 = arith.constant 8 : index
    %c128_112 = arith.constant 128 : index
    %274 = vector.load %arg10[%c8_111, %c128_112] : memref<64x256xf32, #tpu.memory_space<vmem>>, vector<8x128xf32>
    tpu.vector_store %arg10[%c8_111, %c128_112], %272 {strides = array<i32>} : memref<64x256xf32, #tpu.memory_space<vmem>>, vector<8x128xf32>,
    %c56_113 = arith.constant 56 : index
    %c0_114 = arith.constant 0 : index
    %275 = vector.load %arg9[%c56_113, %c0_114] : memref<64x512xf32, #tpu.memory_space<vmem>>, vector<8x512xf32>
    %c0_115 = arith.constant 0 : index
    %c0_116 = arith.constant 0 : index
    %276 = vector.load %arg5[%c0_115, %c0_116] : memref<128x512xf32, #tpu.memory_space<vmem>>, vector<128x512xf32>
    %cst_117 = arith.constant dense<0.000000e+00> : vector<8x512xf32>
    %277 = tpu.matmul %269, %276, %cst_117 {dimension_numbers = #tpu.dot_dimension_numbers<[1], [0], [0], [1], [0, 0, 1, 1], [], []>} : vector<8x128xf32>, vector<128x512xf32>, vector<8x512xf32> -> vector<8x512xf32>
    %278 = arith.addf %275, %277 : vector<8x512xf32>
    %279 = vector.extract_strided_slice %278 {offsets = [0, 0], sizes = [8, 128], strides = [1, 1]} : vector<8x512xf32> to vector<8x128xf32>
    %280 = arith.negf %279 : vector<8x128xf32>
    %281 = math.exp %280 : vector<8x128xf32>
    %cst_118 = arith.constant 1.000000e+00 : f32
    %282 = vector.broadcast %cst_118 : f32 to vector<8x128xf32>
    %283 = arith.addf %282, %281 : vector<8x128xf32>
    %284 = arith.divf %282, %283 : vector<8x128xf32>
    %285 = vector.extract_strided_slice %278 {offsets = [0, 128], sizes = [8, 128], strides = [1, 1]} : vector<8x512xf32> to vector<8x128xf32>
    %286 = arith.negf %285 : vector<8x128xf32>
    %287 = math.exp %286 : vector<8x128xf32>
    %cst_119 = arith.constant 1.000000e+00 : f32
    %288 = vector.broadcast %cst_119 : f32 to vector<8x128xf32>
    %289 = arith.addf %288, %287 : vector<8x128xf32>
    %290 = arith.divf %288, %289 : vector<8x128xf32>
    %291 = vector.extract_strided_slice %278 {offsets = [0, 256], sizes = [8, 128], strides = [1, 1]} : vector<8x512xf32> to vector<8x128xf32>
    %292 = math.tanh %291 : vector<8x128xf32>
    %293 = vector.extract_strided_slice %278 {offsets = [0, 384], sizes = [8, 128], strides = [1, 1]} : vector<8x512xf32> to vector<8x128xf32>
    %294 = arith.negf %293 : vector<8x128xf32>
    %295 = math.exp %294 : vector<8x128xf32>
    %cst_120 = arith.constant 1.000000e+00 : f32
    %296 = vector.broadcast %cst_120 : f32 to vector<8x128xf32>
    %297 = arith.addf %296, %295 : vector<8x128xf32>
    %298 = arith.divf %296, %297 : vector<8x128xf32>
    %299 = arith.mulf %290, %270 : vector<8x128xf32>
    %300 = arith.mulf %284, %292 : vector<8x128xf32>
    %301 = arith.addf %299, %300 : vector<8x128xf32>
    %302 = math.tanh %301 : vector<8x128xf32>
    %303 = arith.mulf %298, %302 : vector<8x128xf32>
    %c56_121 = arith.constant 56 : index
    %c0_122 = arith.constant 0 : index
    %304 = vector.load %arg1[%c56_121, %c0_122] : memref<64x128xf32, #tpu.memory_space<vmem>>, vector<8x128xf32>
    %cst_123 = arith.constant 0.000000e+00 : f32
    %305 = vector.broadcast %cst_123 : f32 to vector<8x128xf32>
    %306 = arith.cmpf ogt, %304, %305 : vector<8x128xf32>
    %cst_124 = arith.constant 0.000000e+00 : f32
    %307 = vector.broadcast %cst_124 : f32 to vector<8x128xf32>
    %308 = arith.select %306, %303, %307 : vector<8x128xi1>, vector<8x128xf32>
    %c56_125 = arith.constant 56 : index
    %c0_126 = arith.constant 0 : index
    %309 = vector.load %arg10[%c56_125, %c0_126] : memref<64x256xf32, #tpu.memory_space<vmem>>, vector<8x128xf32>
    tpu.vector_store %arg10[%c56_125, %c0_126], %308 {strides = array<i32>} : memref<64x256xf32, #tpu.memory_space<vmem>>, vector<8x128xf32>,
    %c0_127 = arith.constant 0 : index
    %c128_128 = arith.constant 128 : index
    %310 = vector.load %arg10[%c0_127, %c128_128] : memref<64x256xf32, #tpu.memory_space<vmem>>, vector<8x128xf32>
    tpu.vector_store %arg10[%c0_127, %c128_128], %308 {strides = array<i32>} : memref<64x256xf32, #tpu.memory_space<vmem>>, vector<8x128xf32>,
    %c0_129 = arith.constant 0 : index
    %c0_130 = arith.constant 0 : index
    %311 = vector.load %arg10[%c0_129, %c0_130] : memref<64x256xf32, #tpu.memory_space<vmem>>, vector<64x256xf32>
    %c0_131 = arith.constant 0 : index
    %c0_132 = arith.constant 0 : index
    %312 = vector.load %arg6[%c0_131, %c0_132] : memref<256x128xf32, #tpu.memory_space<vmem>>, vector<256x128xf32>
    %cst_133 = arith.constant dense<0.000000e+00> : vector<64x128xf32>
    %313 = tpu.matmul %311, %312, %cst_133 {dimension_numbers = #tpu.dot_dimension_numbers<[1], [0], [0], [1], [0, 0, 1, 1], [], []>} : vector<64x256xf32>, vector<256x128xf32>, vector<64x128xf32> -> vector<64x128xf32>
    %c0_134 = arith.constant 0 : index
    %c0_135 = arith.constant 0 : index
    %314 = vector.load %arg7[%c0_134, %c0_135] : memref<1x128xf32, #tpu.memory_space<vmem>>, vector<1x128xf32>
    %315 = vector.broadcast %314 : vector<1x128xf32> to vector<64x128xf32>
    %316 = arith.addf %313, %315 : vector<64x128xf32>
    %cst_136 = arith.constant dense<0xFF800000> : vector<64xf32>
    %317 = vector.multi_reduction <maximumf>, %316, %cst_136 [1] : vector<64x128xf32> to vector<64xf32>
    %318 = vector.shape_cast %317 : vector<64xf32> to vector<64x1xf32>
    %319 = vector.broadcast %318 : vector<64x1xf32> to vector<64x128xf32>
    %320 = arith.subf %316, %319 : vector<64x128xf32>
    %321 = math.exp %320 : vector<64x128xf32>
    %cst_137 = arith.constant dense<0.000000e+00> : vector<64xf32>
    %322 = vector.multi_reduction <add>, %321, %cst_137 [1] : vector<64x128xf32> to vector<64xf32>
    %323 = vector.shape_cast %322 : vector<64xf32> to vector<64x1xf32>
    %324 = math.log %323 : vector<64x1xf32>
    %325 = arith.addf %318, %324 : vector<64x1xf32>
    %c0_138 = arith.constant 0 : index
    %c0_139 = arith.constant 0 : index
    %326 = vector.load %arg2[%c0_138, %c0_139] : memref<64x128xf32, #tpu.memory_space<vmem>>, vector<64x128xf32>
    %327 = vector.broadcast %325 : vector<64x1xf32> to vector<64x128xf32>
    %328 = arith.subf %327, %316 : vector<64x128xf32>
    %329 = arith.mulf %326, %328 : vector<64x128xf32>
    %cst_140 = arith.constant dense<0.000000e+00> : vector<64xf32>
    %330 = vector.multi_reduction <add>, %329, %cst_140 [1] : vector<64x128xf32> to vector<64xf32>
    %331 = vector.shape_cast %330 : vector<64xf32> to vector<64x1xf32>
    %cst_141 = arith.constant dense<0.000000e+00> : vector<1xf32>
    %332 = vector.multi_reduction <add>, %331, %cst_141 [0] : vector<64x1xf32> to vector<1xf32>
    %333 = vector.shape_cast %332 : vector<1xf32> to vector<1x1xf32>
    %cst_142 = arith.constant 1.600000e+01 : f32
    %334 = vector.broadcast %cst_142 : f32 to vector<1x1xf32>
    %335 = arith.divf %333, %334 : vector<1x1xf32>
    %c0_143 = arith.constant 0 : index
    %c0_144 = arith.constant 0 : index
    %336 = vector.load %arg8[%c0_143, %c0_144] : memref<1x1xf32, #tpu.memory_space<vmem>>, vector<1x1xf32>
    tpu.vector_store %arg8[%c0_143, %c0_144], %335 {strides = array<i32>} : memref<1x1xf32, #tpu.memory_space<vmem>>, vector<1x1xf32>,
    return
  }
}

</mosaic_0001>

<bundles_post_ra>
// kernel: eq.1
= control target key start
LH: loop header
LB: loop body
LE: loop exit
PB: predicated region body
PF: predicated region fallthrough
CT: control target
= control target key end

     0   :  { %s67_s10 = smov 56   ;;  %s68_s11 = smov 40   ;;  %vm3_vm0 = vcmask 64512   ;;  %vm9_vm1 = vcmask 523712   ;;  %vm15_vm2 = vcmask 458112   ;;  %vm21_vm3 = vcmask 392512   ;;  %s111_s0 = inlined_call_operand.vmem [shape: s32[8,8], index: 0, kind: input, shape index: {}]   ;;  %s112_s1 = inlined_call_operand.vmem [shape: s32[64], index: 1, kind: output, shape index: {}]  }
   0x1   :  { %v53_v0 = vld [vmem:[%s111_s0 + $0x7] sm:$0x1]   ;;  %v55_v1 = vld [vmem:[%s111_s0 + $0x5] sm:$0x1]   ;;  %v54_v2 = vld [vmem:[%s111_s0 + $0x6] sm:$0x1]  }
   0x2   :  { %7 = vrot.lane.b32.xlu0 %v53_v0, %s67_s10  ;;  %19 = vrot.lane.b32.xlu1 %v55_v1, %s68_s11  ;;  %v56_v3 = vld [vmem:[%s111_s0 + $0x4] sm:$0x1]   ;;  %v2_v4 = vld [vmem:[%s111_s0] sm:$0x1]   ;;  %s69_s18 = smov 48   ;;  %s70_s19 = smov 32  }
   0x3   :  { %4 = vst.msk [vmem:[#allocation0] sm:$0x1] %vm3_vm0, %v2_v4   ;;  %v57_v5 = vld [vmem:[%s111_s0 + $0x3] sm:$0x1]   ;;  %v58_v6 = vld [vmem:[%s111_s0 + $0x2] sm:$0x1]  }
   0x4   :  { %s71_s24 = smov 24   ;;  %s72_s25 = smov 16   ;;  %v59_v7 = vld [vmem:[%s111_s0 + $0x1] sm:$0x1]   ;;  %vm27_vm4 = vcmask 326912   ;;  %vm33_vm5 = vcmask 261312  }
   0x5   :  { %s73_s0 = smov 8   ;;  %vm39_vm6 = vcmask 195712   ;;  %vm45_vm7 = vcmask 130112  }
   0x6   :  { %13 = vrot.lane.b32.xlu0 %v54_v2, %s69_s18  ;;  %25 = vrot.lane.b32.xlu1 %v56_v3, %s70_s19 }
   0xa   :  { %31 = vrot.lane.b32.xlu0 %v57_v5, %s71_s24  ;;  %37 = vrot.lane.b32.xlu1 %v58_v6, %s72_s25 }
   0xe   :  { %43 = vrot.lane.b32.xlu0 %v59_v7, %s73_s0 }
  0x74   :  { %v8_v8 = vpop.permute.xlu0 %7   ;;  %v20_v9 = vpop.permute.xlu1 %19  }
  0x75   :  { %10 = vst.msk [vmem:[#allocation0] sm:$0x1] %vm9_vm1, %v8_v8  }
  0x78   :  { %v14_v10 = vpop.permute.xlu0 %13   ;;  %v26_v11 = vpop.permute.xlu1 %25  }
  0x79   :  { %16 = vst.msk [vmem:[#allocation0] sm:$0x1] %vm15_vm2, %v14_v10  }
  0x7a   :  { %22 = vst.msk [vmem:[#allocation0] sm:$0x1] %vm21_vm3, %v20_v9  }
  0x7b   :  { %28 = vst.msk [vmem:[#allocation0] sm:$0x1] %vm27_vm4, %v26_v11  }
  0x7c   :  { %v32_v12 = vpop.permute.xlu0 %31   ;;  %v38_v13 = vpop.permute.xlu1 %37  }
  0x7d   :  { %34 = vst.msk [vmem:[#allocation0] sm:$0x1] %vm33_vm5, %v32_v12  }
  0x7e   :  { %40 = vst.msk [vmem:[#allocation0] sm:$0x1] %vm39_vm6, %v38_v13  }
  0x80   :  { %v44_v14 = vpop.permute.xlu0 %43  }
  0x81   :  { %46 = vst.msk [vmem:[#allocation0] sm:$0x1] %vm45_vm7, %v44_v14  }
  0x88   :  { %v50_v15 = vld [vmem:[#allocation0] sm:$0x1] }
  0x89   :  { %52 = vst [vmem:[%s112_s1] sm:$0x1] %v50_v15 }

// kernel: mul.5
= control target key start
LH: loop header
LB: loop body
LE: loop exit
PB: predicated region body
PF: predicated region fallthrough
CT: control target
= control target key end

     0   :  { %s67_s10 = smov 56   ;;  %s68_s11 = smov 40   ;;  %vm3_vm0 = vcmask 64512   ;;  %vm9_vm1 = vcmask 523712   ;;  %vm15_vm2 = vcmask 458112   ;;  %vm21_vm3 = vcmask 392512   ;;  %s111_s0 = inlined_call_operand.vmem [shape: f32[8,8], index: 0, kind: input, shape index: {}]   ;;  %s112_s1 = inlined_call_operand.vmem [shape: f32[64], index: 1, kind: output, shape index: {}]  }
   0x1   :  { %v53_v0 = vld [vmem:[%s111_s0 + $0x7] sm:$0x1]   ;;  %v55_v1 = vld [vmem:[%s111_s0 + $0x5] sm:$0x1]   ;;  %v54_v2 = vld [vmem:[%s111_s0 + $0x6] sm:$0x1]  }
   0x2   :  { %7 = vrot.lane.b32.xlu0 %v53_v0, %s67_s10  ;;  %19 = vrot.lane.b32.xlu1 %v55_v1, %s68_s11  ;;  %v56_v3 = vld [vmem:[%s111_s0 + $0x4] sm:$0x1]   ;;  %v2_v4 = vld [vmem:[%s111_s0] sm:$0x1]   ;;  %s69_s18 = smov 48   ;;  %s70_s19 = smov 32  }
   0x3   :  { %4 = vst.msk [vmem:[#allocation0] sm:$0x1] %vm3_vm0, %v2_v4   ;;  %v57_v5 = vld [vmem:[%s111_s0 + $0x3] sm:$0x1]   ;;  %v58_v6 = vld [vmem:[%s111_s0 + $0x2] sm:$0x1]  }
   0x4   :  { %s71_s24 = smov 24   ;;  %s72_s25 = smov 16   ;;  %v59_v7 = vld [vmem:[%s111_s0 + $0x1] sm:$0x1]   ;;  %vm27_vm4 = vcmask 326912   ;;  %vm33_vm5 = vcmask 261312  }
   0x5   :  { %s73_s0 = smov 8   ;;  %vm39_vm6 = vcmask 195712   ;;  %vm45_vm7 = vcmask 130112  }
   0x6   :  { %13 = vrot.lane.b32.xlu0 %v54_v2, %s69_s18  ;;  %25 = vrot.lane.b32.xlu1 %v56_v3, %s70_s19 }
   0xa   :  { %31 = vrot.lane.b32.xlu0 %v57_v5, %s71_s24  ;;  %37 = vrot.lane.b32.xlu1 %v58_v6, %s72_s25 }
   0xe   :  { %43 = vrot.lane.b32.xlu0 %v59_v7, %s73_s0 }
  0x74   :  { %v8_v8 = vpop.permute.xlu0 %7   ;;  %v20_v9 = vpop.permute.xlu1 %19  }
  0x75   :  { %10 = vst.msk [vmem:[#allocation0] sm:$0x1] %vm9_vm1, %v8_v8  }
  0x78   :  { %v14_v10 = vpop.permute.xlu0 %13   ;;  %v26_v11 = vpop.permute.xlu1 %25  }
  0x79   :  { %16 = vst.msk [vmem:[#allocation0] sm:$0x1] %vm15_vm2, %v14_v10  }
  0x7a   :  { %22 = vst.msk [vmem:[#allocation0] sm:$0x1] %vm21_vm3, %v20_v9  }
  0x7b   :  { %28 = vst.msk [vmem:[#allocation0] sm:$0x1] %vm27_vm4, %v26_v11  }
  0x7c   :  { %v32_v12 = vpop.permute.xlu0 %31   ;;  %v38_v13 = vpop.permute.xlu1 %37  }
  0x7d   :  { %34 = vst.msk [vmem:[#allocation0] sm:$0x1] %vm33_vm5, %v32_v12  }
  0x7e   :  { %40 = vst.msk [vmem:[#allocation0] sm:$0x1] %vm39_vm6, %v38_v13  }
  0x80   :  { %v44_v14 = vpop.permute.xlu0 %43  }
  0x81   :  { %46 = vst.msk [vmem:[#allocation0] sm:$0x1] %vm45_vm7, %v44_v14  }
  0x88   :  { %v50_v15 = vld [vmem:[#allocation0] sm:$0x1] }
  0x89   :  { %52 = vst [vmem:[%s112_s1] sm:$0x1] %v50_v15 }

// kernel: ner_loss_pallas.1
= control target key start
LH: loop header
LB: loop body
LE: loop exit
PB: predicated region body
PF: predicated region fallthrough
CT: control target
= control target key end

     0   :  { %v5312_v7 = vmov 0.0   ;;  %s5303_s0 = inlined_call_operand.vmem [shape: f32[64,128], index: 0, kind: input, shape index: {}]   ;;  %s5304_s1 = inlined_call_operand.vmem [shape: f32[64,128], index: 1, kind: input, shape index: {}]   ;;  %s5305_s2 = inlined_call_operand.vmem [shape: f32[64,128], index: 2, kind: input, shape index: {}]   ;;  %s5306_s3 = inlined_call_operand.vmem [shape: f32[128,512], index: 3, kind: input, shape index: {}]   ;;  %s5307_s4 = inlined_call_operand.vmem [shape: f32[1,512], index: 4, kind: input, shape index: {}]   ;;  %s5308_s5 = inlined_call_operand.vmem [shape: f32[128,512], index: 5, kind: input, shape index: {}]   ;;  %s5309_s6 = inlined_call_operand.vmem [shape: f32[256,128], index: 6, kind: input, shape index: {}]   ;;  %s5310_s7 = inlined_call_operand.vmem [shape: f32[1,128], index: 7, kind: input, shape index: {}]   ;;  %s5311_s8 = inlined_call_operand.hbm [shape: f32[1,1], index: 8, kind: output, shape index: {}]  }
   0x1   :  { %v39_v0 = vld [vmem:[%s5306_s3 + $0x8] sm:$0xff]  ;;  %v38_v2 = vld [vmem:[%s5306_s3] sm:$0xff]  ;;  %188 = vmatprep.mubr.f32.mxu1 %v5312_v7  ;;  %514 = vmatprep.mubr.f32.mxu0 %v5312_v7 }
   0x2   :  { %v43_v1 = vld [vmem:[%s5306_s3 + $0x28] sm:$0xff]  ;;  %v42_v4 = vld [vmem:[%s5306_s3 + $0x20] sm:$0xff] }
   0x3   :  { %v2749_v3 = vpack.c.bf16 %v43_v1, %v39_v0  ;;  %v387_v5 = vld [vmem:[%s5308_s5 + $0x8] sm:$0xff]  ;;  %v2751_v8 = vpack.c.bf16 %v42_v4, %v38_v2  ;;  %v386_v10 = vld [vmem:[%s5308_s5] sm:$0xff] }
   0x4   :  { %v391_v6 = vld [vmem:[%s5308_s5 + $0x28] sm:$0xff]  ;;  %v390_v11 = vld [vmem:[%s5308_s5 + $0x20] sm:$0xff] }
   0x5   :  { %v3674_v9 = vpack.c.bf16 %v391_v6, %v387_v5  ;;  %v47_v12 = vld [vmem:[%s5306_s3 + $0x48] sm:$0xff]  ;;  %2750 = vmatprep.subr.bf16.mxu1 %v2749_v3  ;;  %v3685_v13 = vpack.c.bf16 %v390_v11, %v386_v10  ;;  %v46_v15 = vld [vmem:[%s5306_s3 + $0x40] sm:$0xff] }
   0x6   :  { %v51_v14 = vld [vmem:[%s5306_s3 + $0x68] sm:$0xff]  ;;  %v50_v16 = vld [vmem:[%s5306_s3 + $0x60] sm:$0xff]  ;;  %2752 = vmatpush1.bf16.msra.mxu1 %v2751_v8 }
   0x7   :  { %2814 = vmatprep.subr.bf16.mxu0 %v3674_v9  ;;  %v2753_v17 = vpack.c.bf16 %v51_v14, %v47_v12  ;;  %v2755_v18 = vpack.c.bf16 %v50_v16, %v46_v15  ;;  %v395_v19 = vld [vmem:[%s5308_s5 + $0x48] sm:$0xff]  ;;  %v394_v21 = vld [vmem:[%s5308_s5 + $0x40] sm:$0xff] }
   0x8   :  { %v399_v20 = vld [vmem:[%s5308_s5 + $0x68] sm:$0xff]  ;;  %2816 = vmatpush1.bf16.msra.mxu0 %v3685_v13  ;;  %v398_v23 = vld [vmem:[%s5308_s5 + $0x60] sm:$0xff] }
   0x9   :  { %v3707_v22 = vpack.c.bf16 %v399_v20, %v395_v19  ;;  %v55_v24 = vld [vmem:[%s5306_s3 + $0x88] sm:$0xff]  ;;  %2754 = vmatprep.subr.bf16.mxu1 %v2753_v17  ;;  %v3718_v26 = vpack.c.bf16 %v398_v23, %v394_v21  ;;  %v54_v28 = vld [vmem:[%s5306_s3 + $0x80] sm:$0xff] }
   0xa   :  { %v59_v25 = vld [vmem:[%s5306_s3 + $0xa8] sm:$0xff]  ;;  %v58_v29 = vld [vmem:[%s5306_s3 + $0xa0] sm:$0xff]  ;;  %2756 = vmatpush1.bf16.msra.mxu1 %v2755_v18 }
   0xb   :  { %v2757_v27 = vpack.c.bf16 %v59_v25, %v55_v24  ;;  %v403_v30 = vld [vmem:[%s5308_s5 + $0x88] sm:$0xff]  ;;  %2818 = vmatprep.subr.bf16.mxu0 %v3707_v22  ;;  %v402_v32 = vld [vmem:[%s5308_s5 + $0x80] sm:$0xff]  ;;  %v2759_v34 = vpack.c.bf16 %v58_v29, %v54_v28 }
   0xc   :  { %v407_v31 = vld [vmem:[%s5308_s5 + $0xa8] sm:$0xff]  ;;  %v406_v33 = vld [vmem:[%s5308_s5 + $0xa0] sm:$0xff]  ;;  %2820 = vmatpush1.bf16.msra.mxu0 %v3718_v26 }
   0xd   :  { %v3739_v35 = vpack.c.bf16 %v407_v31, %v403_v30  ;;  %v63_v36 = vld [vmem:[%s5306_s3 + $0xc8] sm:$0xff]  ;;  %v62_v38 = vld [vmem:[%s5306_s3 + $0xc0] sm:$0xff]  ;;  %2758 = vmatprep.subr.bf16.mxu1 %v2757_v27  ;;  %v3751_v39 = vpack.c.bf16 %v406_v33, %v402_v32 }
   0xe   :  { %v67_v37 = vld [vmem:[%s5306_s3 + $0xe8] sm:$0xff]  ;;  %v66_v41 = vld [vmem:[%s5306_s3 + $0xe0] sm:$0xff]  ;;  %2760 = vmatpush1.bf16.msra.mxu1 %v2759_v34 }
   0xf   :  { %v2761_v40 = vpack.c.bf16 %v67_v37, %v63_v36  ;;  %v411_v42 = vld [vmem:[%s5308_s5 + $0xc8] sm:$0xff]  ;;  %2822 = vmatprep.subr.bf16.mxu0 %v3739_v35  ;;  %v410_v45 = vld [vmem:[%s5308_s5 + $0xc0] sm:$0xff]  ;;  %v2763_v49 = vpack.c.bf16 %v66_v41, %v62_v38  ;;  %v41_v37 = vld [vmem:[%s5306_s3 + $0x18] sm:$0xff] }
  0x10   :  { %v415_v43 = vld [vmem:[%s5308_s5 + $0xe8] sm:$0xff]  ;;  %v414_v46 = vld [vmem:[%s5308_s5 + $0xe0] sm:$0xff]  ;;  %2824 = vmatpush1.bf16.msra.mxu0 %v3751_v39  ;;  %v45_v38 = vld [vmem:[%s5306_s3 + $0x38] sm:$0xff] }
  0x11   :  { %v3763_v44 = vpack.c.bf16 %v415_v43, %v411_v42  ;;  %v71_v47 = vld [vmem:[%s5306_s3 + $0x108] sm:$0xff]  ;;  %2762 = vmatprep.subr.bf16.mxu1 %v2761_v40  ;;  %v3784_v52 = vpack.c.bf16 %v414_v46, %v410_v45  ;;  %v70_v54 = vld [vmem:[%s5306_s3 + $0x100] sm:$0xff]  ;;  %v2781_v42 = vpack.c.bf16 %v45_v38, %v41_v37  ;;  %v40_v43 = vld [vmem:[%s5306_s3 + $0x10] sm:$0xff] }
  0x12   :  { %v75_v48 = vld [vmem:[%s5306_s3 + $0x128] sm:$0xff]  ;;  %v74_v55 = vld [vmem:[%s5306_s3 + $0x120] sm:$0xff]  ;;  %2764 = vmatpush1.bf16.msra.mxu1 %v2763_v49  ;;  %v44_v45 = vld [vmem:[%s5306_s3 + $0x30] sm:$0xff] }
  0x13   :  { %v419_v50 = vld [vmem:[%s5308_s5 + $0x108] sm:$0xff]  ;;  %v2765_v53 = vpack.c.bf16 %v75_v48, %v71_v47  ;;  %v418_v56 = vld [vmem:[%s5308_s5 + $0x100] sm:$0xff]  ;;  %2826 = vmatprep.subr.bf16.mxu0 %v3763_v44  ;;  %v2767_v63 = vpack.c.bf16 %v74_v55, %v70_v54  ;;  %v49_v46 = vld [vmem:[%s5306_s3 + $0x58] sm:$0xff]  ;;  %v2783_v49 = vpack.c.bf16 %v44_v45, %v40_v43 }
  0x14   :  { %v423_v51 = vld [vmem:[%s5308_s5 + $0x128] sm:$0xff]  ;;  %v422_v58 = vld [vmem:[%s5308_s5 + $0x120] sm:$0xff]  ;;  %2828 = vmatpush1.bf16.msra.mxu0 %v3784_v52  ;;  %v53_v47 = vld [vmem:[%s5306_s3 + $0x78] sm:$0xff] }
  0x15   :  { %v3796_v57 = vpack.c.bf16 %v423_v51, %v419_v50  ;;  %v79_v59 = vld [vmem:[%s5306_s3 + $0x148] sm:$0xff]  ;;  %2766 = vmatprep.subr.bf16.mxu1 %v2765_v53  ;;  %v3814_v0 = vpack.c.bf16 %v422_v58, %v418_v56  ;;  %v78_v2 = vld [vmem:[%s5306_s3 + $0x140] sm:$0xff]  ;;  %v2785_v50 = vpack.c.bf16 %v53_v47, %v49_v46  ;;  %v48_v51 = vld [vmem:[%s5306_s3 + $0x50] sm:$0xff] }
  0x16   :  { %v83_v60 = vld [vmem:[%s5306_s3 + $0x168] sm:$0xff]  ;;  %v82_v3 = vld [vmem:[%s5306_s3 + $0x160] sm:$0xff]  ;;  %2768 = vmatpush1.bf16.msra.mxu1 %v2767_v63  ;;  %v52_v53 = vld [vmem:[%s5306_s3 + $0x70] sm:$0xff] }
  0x17   :  { %v427_v61 = vld [vmem:[%s5308_s5 + $0x148] sm:$0xff]  ;;  %v2769_v1 = vpack.c.bf16 %v83_v60, %v79_v59  ;;  %v426_v4 = vld [vmem:[%s5308_s5 + $0x140] sm:$0xff]  ;;  %2830 = vmatprep.subr.bf16.mxu0 %v3796_v57  ;;  %v2771_v14 = vpack.c.bf16 %v82_v3, %v78_v2  ;;  %v57_v54 = vld [vmem:[%s5306_s3 + $0x98] sm:$0xff]  ;;  %v2787_v58 = vpack.c.bf16 %v52_v53, %v48_v51 }
  0x18   :  { %v431_v62 = vld [vmem:[%s5308_s5 + $0x168] sm:$0xff]  ;;  %v430_v6 = vld [vmem:[%s5308_s5 + $0x160] sm:$0xff]  ;;  %2832 = vmatpush1.bf16.msra.mxu0 %v3814_v0  ;;  %v61_v55 = vld [vmem:[%s5306_s3 + $0xb8] sm:$0xff] }
  0x19   :  { %v3826_v5 = vpack.c.bf16 %v431_v62, %v427_v61  ;;  %v87_v8 = vld [vmem:[%s5306_s3 + $0x188] sm:$0xff]  ;;  %2770 = vmatprep.subr.bf16.mxu1 %v2769_v1  ;;  %v3844_v15 = vpack.c.bf16 %v430_v6, %v426_v4  ;;  %v86_v17 = vld [vmem:[%s5306_s3 + $0x180] sm:$0xff]  ;;  %v2789_v59 = vpack.c.bf16 %v61_v55, %v57_v54  ;;  %v56_v60 = vld [vmem:[%s5306_s3 + $0x90] sm:$0xff] }
  0x1a   :  { %v91_v10 = vld [vmem:[%s5306_s3 + $0x1a8] sm:$0xff]  ;;  %v90_v18 = vld [vmem:[%s5306_s3 + $0x1a0] sm:$0xff]  ;;  %2772 = vmatpush1.bf16.msra.mxu1 %v2771_v14  ;;  %v65_v61 = vld [vmem:[%s5306_s3 + $0xd8] sm:$0xff] }
  0x1b   :  { %v435_v11 = vld [vmem:[%s5308_s5 + $0x188] sm:$0xff]  ;;  %v2773_v16 = vpack.c.bf16 %v91_v10, %v87_v8  ;;  %v434_v19 = vld [vmem:[%s5308_s5 + $0x180] sm:$0xff]  ;;  %2834 = vmatprep.subr.bf16.mxu0 %v3826_v5  ;;  %v2775_v28 = vpack.c.bf16 %v90_v18, %v86_v17  ;;  %v69_v62 = vld [vmem:[%s5306_s3 + $0xf8] sm:$0xff] }
  0x1c   :  { %v439_v12 = vld [vmem:[%s5308_s5 + $0x1a8] sm:$0xff]  ;;  %v438_v21 = vld [vmem:[%s5308_s5 + $0x1a0] sm:$0xff]  ;;  %2836 = vmatpush1.bf16.msra.mxu0 %v3844_v15  ;;  %v3960_v63 = vld [vmem:[%s5303_s0 + $0x10] sm:$0xff]  ;;  %v2793_v2 = vpack.c.bf16 %v69_v62, %v65_v61 }
  0x1d   :  { %v3856_v20 = vpack.c.bf16 %v439_v12, %v435_v11  ;;  %v95_v23 = vld [vmem:[%s5306_s3 + $0x1c8] sm:$0xff]  ;;  %2774 = vmatprep.subr.bf16.mxu1 %v2773_v16  ;;  %v3874_v29 = vpack.c.bf16 %v438_v21, %v434_v19  ;;  %v94_v31 = vld [vmem:[%s5306_s3 + $0x1c0] sm:$0xff]  ;;  %v68_v3 = vld [vmem:[%s5306_s3 + $0xf0] sm:$0xff] }
  0x1e   :  { %v99_v24 = vld [vmem:[%s5306_s3 + $0x1e8] sm:$0xff]  ;;  %v98_v32 = vld [vmem:[%s5306_s3 + $0x1e0] sm:$0xff]  ;;  %2776 = vmatpush1.bf16.msra.mxu1 %v2775_v28  ;;  %v77_v4 = vld [vmem:[%s5306_s3 + $0x138] sm:$0xff] }
  0x1f   :  { %v443_v25 = vld [vmem:[%s5308_s5 + $0x1c8] sm:$0xff]  ;;  %v2777_v30 = vpack.c.bf16 %v99_v24, %v95_v23  ;;  %v442_v33 = vld [vmem:[%s5308_s5 + $0x1c0] sm:$0xff]  ;;  %2838 = vmatprep.subr.bf16.mxu0 %v3856_v20  ;;  %v2779_v40 = vpack.c.bf16 %v98_v32, %v94_v31  ;;  %v3981_v6 = vld [vmem:[%s5303_s0 + $0x18] sm:$0xff] }
  0x20   :  { %v447_v27 = vld [vmem:[%s5308_s5 + $0x1e8] sm:$0xff]  ;;  %v446_v36 = vld [vmem:[%s5308_s5 + $0x1e0] sm:$0xff]  ;;  %2840 = vmatpush1.bf16.msra.mxu0 %v3874_v29  ;;  %v72_v11 = vld [vmem:[%s5306_s3 + $0x110] sm:$0xff] }
  0x21   :  { %v3886_v34 = vpack.c.bf16 %v447_v27, %v443_v25  ;;  %2778 = vmatprep.subr.bf16.mxu1 %v2777_v30  ;;  %v3898_v41 = vpack.c.bf16 %v446_v36, %v442_v33  ;;  %v3916_v48 = vld [vmem:[%s5303_s0] sm:$0xff]  ;;  %v3937_v56 = vld [vmem:[%s5303_s0 + $0x8] sm:$0xff] }
  0x22   :  { %2780 = vmatpush1.bf16.msra.mxu1 %v2779_v40 }
  0x23   :  { %2842 = vmatprep.subr.bf16.mxu0 %v3886_v34  ;;  %2782 = vmatprep.subr.bf16.mxu1 %v2781_v42 }
  0x24   :  { %2844 = vmatpush1.bf16.msra.mxu0 %v3898_v41 }
  0x25   :  { %2878 = vmatprep.subr.bf16.mxu0 %v3674_v9  ;;  %189 = vmatmul.mubr.f32.vlgmr.msra.gmra.mrb[0].mxu1 %v3916_v48  ;;  %v60_v9 = vld [vmem:[%s5306_s3 + $0xb0] sm:$0xff] }
  0x26   :  { %2784 = vmatpush1.bf16.msra.mxu1 %v2783_v49  ;;  %194 = vmatprep.mubr.f32.mxu1 %v5312_v7  ;;  %v2791_v1 = vpack.c.bf16 %v60_v9, %v56_v60 }
  0x27   :  { %515 = vmatmul.mubr.f32.vlgmr.msra.gmra.mrb[0].mxu0 %v5312_v7  ;;  %2786 = vmatprep.subr.bf16.mxu1 %v2785_v50 }
  0x28   :  { %2880 = vmatpush1.bf16.msra.mxu0 %v3685_v13  ;;  %758 = vmatprep.mubr.f32.mxu0 %v5312_v7  ;;  %v64_v13 = vld [vmem:[%s5306_s3 + $0xd0] sm:$0xff] }
  0x29   :  { %195 = vmatmul.mubr.f32.gmra.mrb[2].mxu1 %v3937_v56  ;;  %2882 = vmatprep.subr.bf16.mxu0 %v3707_v22  ;;  %v73_v22 = vld [vmem:[%s5306_s3 + $0x118] sm:$0xff]  ;;  %v2795_v8 = vpack.c.bf16 %v68_v3, %v64_v13 }
  0x2a   :  { %2788 = vmatpush1.bf16.msra.mxu1 %v2787_v58  ;;  %200 = vmatprep.mubr.f32.mxu1 %v5312_v7  ;;  %v2797_v10 = vpack.c.bf16 %v77_v4, %v73_v22 }
  0x2b   :  { %2790 = vmatprep.subr.bf16.mxu1 %v2789_v59 }
  0x2c   :  { %2884 = vmatpush1.bf16.msra.mxu0 %v3718_v26  ;;  %v76_v26 = vld [vmem:[%s5306_s3 + $0x130] sm:$0xff] }
  0x2d   :  { %201 = vmatmul.mubr.f32.gmra.mrb[4].mxu1 %v3960_v63  ;;  %2886 = vmatprep.subr.bf16.mxu0 %v3739_v35 }
  0x2e   :  { %2792 = vmatpush1.bf16.msra.mxu1 %v2791_v1  ;;  %206 = vmatprep.mubr.f32.mxu1 %v5312_v7 }
  0x2f   :  { %2794 = vmatprep.subr.bf16.mxu1 %v2793_v2 }
  0x30   :  { %13 = vsyncpa [#allocation5], 0  ;;  %v81_v35 = vld [vmem:[%s5306_s3 + $0x158] sm:$0xff]  ;;  %2888 = vmatpush1.bf16.msra.mxu0 %v3751_v39  ;;  %v4002_v14 = vld [vmem:[%s5303_s0 + $0x20] sm:$0xff]  ;;  %v2799_v16 = vpack.c.bf16 %v76_v26, %v72_v11  ;;  %vm2634_vm8 = vcmask 0  }
  0x31   :  { %v85_v12 = vld [vmem:[%s5306_s3 + $0x178] sm:$0xff]  ;;  %207 = vmatmul.mubr.f32.gmra.mrb[6].mxu1 %v3981_v6  ;;  %2890 = vmatprep.subr.bf16.mxu0 %v3763_v44  ;;  %v80_v18 = vld [vmem:[%s5306_s3 + $0x150] sm:$0xff]  ;;  %v4023_v21 = vld [vmem:[%s5303_s0 + $0x28] sm:$0xff] }
  0x32   :  { %2796 = vmatpush1.bf16.msra.mxu1 %v2795_v8  ;;  %212 = vmatprep.mubr.f32.mxu1 %v5312_v7  ;;  %v2801_v17 = vpack.c.bf16 %v85_v12, %v81_v35  ;;  %v84_v39 = vld [vmem:[%s5306_s3 + $0x170] sm:$0xff]  ;;  %v89_v44 = vld [vmem:[%s5306_s3 + $0x198] sm:$0xff] }
  0x33   :  { %2798 = vmatprep.subr.bf16.mxu1 %v2797_v10  ;;  %v93_v19 = vld [vmem:[%s5306_s3 + $0x1b8] sm:$0xff]  ;;  %v2803_v23 = vpack.c.bf16 %v84_v39, %v80_v18  ;;  %v88_v25 = vld [vmem:[%s5306_s3 + $0x190] sm:$0xff] }
  0x34   :  { %2892 = vmatpush1.bf16.msra.mxu0 %v3784_v52  ;;  %v2805_v24 = vpack.c.bf16 %v93_v19, %v89_v44  ;;  %v92_v52 = vld [vmem:[%s5306_s3 + $0x1b0] sm:$0xff]  ;;  %v101_v27 = vld [vmem:[%s5306_s3 + $0x1f8] sm:$0xff]  ;;  %v104_v19 = vlaneseq }
  0x35   :  { %213 = vmatmul.mubr.f32.gmra.mrb[8].mxu1 %v4002_v14  ;;  %2894 = vmatprep.subr.bf16.mxu0 %v3796_v57  ;;  %v97_v57 = vld [vmem:[%s5306_s3 + $0x1d8] sm:$0xff]  ;;  %v4044_v28 = vld [vmem:[%s5303_s0 + $0x30] sm:$0xff]  ;;  %v2807_v30 = vpack.c.bf16 %v92_v52, %v88_v25 }
  0x36   :  { %2800 = vmatpush1.bf16.msra.mxu1 %v2799_v16  ;;  %218 = vmatprep.mubr.f32.mxu1 %v5312_v7  ;;  %v2809_v31 = vpack.c.bf16 %v101_v27, %v97_v57  ;;  %v96_v32 = vld [vmem:[%s5306_s3 + $0x1d0] sm:$0xff]  ;;  %v393_v33 = vld [vmem:[%s5308_s5 + $0x38] sm:$0xff] }
  0x37   :  { %2802 = vmatprep.subr.bf16.mxu1 %v2801_v17  ;;  %v4065_v36 = vld [vmem:[%s5303_s0 + $0x38] sm:$0xff]  ;;  %v396_v46 = vld [vmem:[%s5308_s5 + $0x50] sm:$0xff] }
  0x38   :  { %2896 = vmatpush1.bf16.msra.mxu0 %v3814_v0  ;;  %v100_v0 = vld [vmem:[%s5306_s3 + $0x1f0] sm:$0xff]  ;;  %v397_v40 = vld [vmem:[%s5308_s5 + $0x58] sm:$0xff] }
  0x39   :  { %219 = vmatmul.mubr.f32.gmra.mrb[10].mxu1 %v4023_v21  ;;  %2898 = vmatprep.subr.bf16.mxu0 %v3826_v5  ;;  %v389_v5 = vld [vmem:[%s5308_s5 + $0x18] sm:$0xff]  ;;  %v2811_v37 = vpack.c.bf16 %v100_v0, %v96_v32  ;;  %v404_v51 = vld [vmem:[%s5308_s5 + $0x90] sm:$0xff] }
  0x3a   :  { %2804 = vmatpush1.bf16.msra.mxu1 %v2803_v23  ;;  %224 = vmatprep.mubr.f32.mxu1 %v5312_v7  ;;  %v4067_v38 = vpack.c.bf16 %v393_v33, %v389_v5  ;;  %v401_v42 = vld [vmem:[%s5308_s5 + $0x78] sm:$0xff]  ;;  %v412_v58 = vld [vmem:[%s5308_s5 + $0xd0] sm:$0xff] }
  0x3b   :  { %2806 = vmatprep.subr.bf16.mxu1 %v2805_v24  ;;  %v4088_v45 = vpack.c.bf16 %v401_v42, %v397_v40  ;;  %v409_v47 = vld [vmem:[%s5308_s5 + $0xb8] sm:$0xff]  ;;  %v416_v59 = vld [vmem:[%s5308_s5 + $0xf0] sm:$0xff]  ;;  %v102_v24 = vld [vmem:[%s5307_s4] sm:$0xf] }
  0x3c   :  { %2900 = vmatpush1.bf16.msra.mxu0 %v3844_v15  ;;  %v388_v15 = vld [vmem:[%s5308_s5 + $0x10] sm:$0xff]  ;;  %v417_v53 = vld [vmem:[%s5308_s5 + $0xf8] sm:$0xff]  ;;  %v4146_v9 = vpack.c.bf16 %v416_v59, %v412_v58 }
  0x3d   :  { %225 = vmatmul.mubr.f32.gmra.mrb[12].mxu1 %v4044_v28  ;;  %2902 = vmatprep.subr.bf16.mxu0 %v3856_v20  ;;  %v392_v20 = vld [vmem:[%s5308_s5 + $0x30] sm:$0xff]  ;;  %v425_v60 = vld [vmem:[%s5308_s5 + $0x138] sm:$0xff] }
  0x3e   :  { %2808 = vmatpush1.bf16.msra.mxu1 %v2807_v30  ;;  %230 = vmatprep.mubr.f32.mxu1 %v5312_v7  ;;  %v4085_v43 = vpack.c.bf16 %v392_v20, %v388_v15  ;;  %v420_v62 = vld [vmem:[%s5308_s5 + $0x110] sm:$0xff]  ;;  %v433_v2 = vld [vmem:[%s5308_s5 + $0x178] sm:$0xff] }
  0x3f   :  { %2810 = vmatprep.subr.bf16.mxu1 %v2809_v31  ;;  %v424_v1 = vld [vmem:[%s5308_s5 + $0x130] sm:$0xff]  ;;  %v441_v8 = vld [vmem:[%s5308_s5 + $0x1b8] sm:$0xff] }
  0x40   :  { %2904 = vmatpush1.bf16.msra.mxu0 %v3874_v29  ;;  %v400_v29 = vld [vmem:[%s5308_s5 + $0x70] sm:$0xff]  ;;  %v4166_v13 = vpack.c.bf16 %v424_v1, %v420_v62  ;;  %v445_v12 = vld [vmem:[%s5308_s5 + $0x1d8] sm:$0xff] }
  0x41   :  { %231 = vmatmul.mubr.f32.gmra.mrb[14].mxu1 %v4065_v36  ;;  %2906 = vmatprep.subr.bf16.mxu0 %v3886_v34  ;;  %v405_v34 = vld [vmem:[%s5308_s5 + $0x98] sm:$0xff]  ;;  %v4106_v49 = vpack.c.bf16 %v400_v29, %v396_v46  ;;  %v428_v22 = vld [vmem:[%s5308_s5 + $0x150] sm:$0xff] }
  0x42   :  { %2812 = vmatpush1.bf16.msra.mxu1 %v2811_v37  ;;  %301 = vmatprep.mubr.f32.mxu1 %v5312_v7  ;;  %v4109_v50 = vpack.c.bf16 %v409_v47, %v405_v34  ;;  %v432_v4 = vld [vmem:[%s5308_s5 + $0x170] sm:$0xff] }
  0x43   :  { %2846 = vmatprep.subr.bf16.mxu1 %v4067_v38  ;;  %v4186_v10 = vpack.c.bf16 %v432_v4, %v428_v22  ;;  %v436_v26 = vld [vmem:[%s5308_s5 + $0x190] sm:$0xff] }
  0x44   :  { %2908 = vmatpush1.bf16.msra.mxu0 %v3898_v41  ;;  %v408_v41 = vld [vmem:[%s5308_s5 + $0xb0] sm:$0xff] }
  0x45   :  { %302 = vmatmul.mubr.f32.vlgmr.msra.gmra.mrb[16].mxu1 %v3916_v48  ;;  %v413_v48 = vld [vmem:[%s5308_s5 + $0xd8] sm:$0xff]  ;;  %v4126_v54 = vpack.c.bf16 %v408_v41, %v404_v51  ;;  %v440_v35 = vld [vmem:[%s5308_s5 + $0x1b0] sm:$0xff] }
  0x46   :  { %2848 = vmatpush1.bf16.msra.mxu1 %v4085_v43  ;;  %307 = vmatprep.mubr.f32.mxu1 %v5312_v7  ;;  %v4129_v55 = vpack.c.bf16 %v417_v53, %v413_v48  ;;  %v4206_v16 = vpack.c.bf16 %v440_v35, %v436_v26  ;;  %v444_v18 = vld [vmem:[%s5308_s5 + $0x1d0] sm:$0xff] }
  0x47   :  { %2850 = vmatprep.subr.bf16.mxu1 %v4088_v45  ;;  %v448_v39 = vld [vmem:[%s5308_s5 + $0x1f0] sm:$0xff] }
  0x48   :  { %v4220_v44 = vpack.c.bf16 %v448_v39, %v444_v18 }
  0x49   :  { %308 = vmatmul.mubr.f32.gmra.mrb[18].mxu1 %v3937_v56  ;;  %v421_v56 = vld [vmem:[%s5308_s5 + $0x118] sm:$0xff] }
  0x4a   :  { %2852 = vmatpush1.bf16.msra.mxu1 %v4106_v49  ;;  %313 = vmatprep.mubr.f32.mxu1 %v5312_v7  ;;  %v4149_v61 = vpack.c.bf16 %v425_v60, %v421_v56 }
  0x4b   :  { %2854 = vmatprep.subr.bf16.mxu1 %v4109_v50 }
  0x4d   :  { %314 = vmatmul.mubr.f32.gmra.mrb[20].mxu1 %v3960_v63  ;;  %v429_v63 = vld [vmem:[%s5308_s5 + $0x158] sm:$0xff] }
  0x4e   :  { %2856 = vmatpush1.bf16.msra.mxu1 %v4126_v54  ;;  %319 = vmatprep.mubr.f32.mxu1 %v5312_v7  ;;  %v4169_v3 = vpack.c.bf16 %v433_v2, %v429_v63 }
  0x4f   :  { %2858 = vmatprep.subr.bf16.mxu1 %v4129_v55 }
  0x51   :  { %320 = vmatmul.mubr.f32.gmra.mrb[22].mxu1 %v3981_v6  ;;  %v437_v6 = vld [vmem:[%s5308_s5 + $0x198] sm:$0xff] }
  0x52   :  { %2860 = vmatpush1.bf16.msra.mxu1 %v4146_v9  ;;  %325 = vmatprep.mubr.f32.mxu1 %v5312_v7  ;;  %v4189_v11 = vpack.c.bf16 %v441_v8, %v437_v6 }
  0x53   :  { %2862 = vmatprep.subr.bf16.mxu1 %v4149_v61 }
  0x55   :  { %326 = vmatmul.mubr.f32.gmra.mrb[24].mxu1 %v4002_v14  ;;  %v449_v14 = vld [vmem:[%s5308_s5 + $0x1f8] sm:$0xff] }
  0x56   :  { %2864 = vmatpush1.bf16.msra.mxu1 %v4166_v13  ;;  %331 = vmatprep.mubr.f32.mxu1 %v5312_v7  ;;  %v4209_v17 = vpack.c.bf16 %v449_v14, %v445_v12 }
  0x57   :  { %2866 = vmatprep.subr.bf16.mxu1 %v4169_v3 }
  0x59   :  { %332 = vmatmul.mubr.f32.gmra.mrb[26].mxu1 %v4023_v21  ;;  %v105_v21 = vshrl.u32 %v104_v19, 7 }
  0x5a   :  { %2868 = vmatpush1.bf16.msra.mxu1 %v4186_v10  ;;  %337 = vmatprep.mubr.f32.mxu1 %v5312_v7 }
  0x5b   :  { %2870 = vmatprep.subr.bf16.mxu1 %v4189_v11  ;;  %v106_v23 = vsub.s32 0, %v105_v21  ;;  %v110_v25 = vsub.s32 1, %v105_v21  ;;  %v114_v18 = vsub.s32 2, %v105_v21  ;;  %v118_v19 = vsub.s32 3, %v105_v21 }
  0x5d   :  { %338 = vmatmul.mubr.f32.gmra.mrb[28].mxu1 %v4044_v28  ;;  %v107_v52 = vrot.slane %v102_v24, %v106_v23  ;;  %v111_v57 = vrot.slane %v102_v24, %v110_v25 }
  0x5e   :  { %2872 = vmatpush1.bf16.msra.mxu1 %v4206_v16  ;;  %343 = vmatprep.mubr.f32.mxu1 %v5312_v7 }
  0x5f   :  { %2874 = vmatprep.subr.bf16.mxu1 %v4209_v17 }
  0x61   :  { %344 = vmatmul.mubr.f32.gmra.mrb[30].mxu1 %v4065_v36 }
  0x62   :  { %2876 = vmatpush1.bf16.msra.mxu1 %v4220_v44  ;;  %585 = vmatprep.mubr.f32.mxu1 %v5312_v7 }
  0x63   :  { %2910 = vmatprep.subr.bf16.mxu1 %v4067_v38 }
  0x65   :  { %586 = vmatmul.mubr.f32.vlgmr.msra.gmra.mrb[16].mxu1 %v5312_v7 }
  0x66   :  { %2912 = vmatpush1.bf16.msra.mxu1 %v4085_v43  ;;  %829 = vmatprep.mubr.f32.mxu1 %v5312_v7 }
  0x67   :  { %2914 = vmatprep.subr.bf16.mxu1 %v4088_v45 }
  0x6a   :  { %2916 = vmatpush1.bf16.msra.mxu1 %v4106_v49 }
  0x6b   :  { %2918 = vmatprep.subr.bf16.mxu1 %v4109_v50 }
  0x6e   :  { %2920 = vmatpush1.bf16.msra.mxu1 %v4126_v54 }
  0x6f   :  { %2922 = vmatprep.subr.bf16.mxu1 %v4129_v55 }
  0x72   :  { %2924 = vmatpush1.bf16.msra.mxu1 %v4146_v9 }
  0x73   :  { %2926 = vmatprep.subr.bf16.mxu1 %v4149_v61 }
  0x76   :  { %2928 = vmatpush1.bf16.msra.mxu1 %v4166_v13 }
  0x77   :  { %2930 = vmatprep.subr.bf16.mxu1 %v4169_v3 }
  0x7a   :  { %2932 = vmatpush1.bf16.msra.mxu1 %v4186_v10 }
  0x7b   :  { %2934 = vmatprep.subr.bf16.mxu1 %v4189_v11 }
  0x7e   :  { %2936 = vmatpush1.bf16.msra.mxu1 %v4206_v16 }
  0x7f   :  { %2938 = vmatprep.subr.bf16.mxu1 %v4209_v17 }
  0x82   :  { %2940 = vmatpush1.bf16.msra.mxu1 %v4220_v44 }
  0x83   :  { %2974 = vmatprep.subr.bf16.mxu1 %v4067_v38 }
  0xf8   :  { %v190_v27 = vpop.f32.mrb[0].mxu1 }
  0xf9   :  { %v191_v28 = vadd.f32 %v190_v27, %v107_v52  ;;  %v192_v30 = vpop.f32.mrb[1].mxu1  ;;  %v4276_v27 = vrot.slane %v102_v24, %v114_v18  ;;  %v892_v18 = vld [vmem:[%s5308_s5 + $0x88] sm:$0xff] }
  0xfa   :  { %v516_v31 = vpop.f32.mrb[0].mxu0  ;;  %v193_v32 = vadd.f32 %v192_v30, %v111_v57  ;;  %v4278_v30 = vrot.slane %v102_v24, %v118_v19 }
  0xfb   :  { %v518_v0 = vpop.f32.mrb[1].mxu0  ;;  %v592_v5 = vadd.f32 %v516_v31, %v191_v28 }
  0xfc   :  { %v593_v33 = vadd.f32 %v518_v0, %v193_v32  ;;  %v196_v36 = vpop.f32.mrb[2].mxu1 }
  0xfd   :  { %v4248_v37 = vadd.f32 %v196_v36, %v107_v52  ;;  %v198_v15 = vpop.f32.mrb[3].mxu1  ;;  %v2650_v14 = vmul.f32 -1.442695, %v592_v5 }
  0xfe   :  { %v4250_v20 = vadd.f32 %v198_v15, %v111_v57  ;;  %v2651_v12 = vmul.f32 -1.442695, %v593_v33 }
 0x100   :  { %v202_v40 = vpop.f32.mrb[4].mxu1  ;;  %3423 = vpow2.f32 %v2651_v12  ;;  %v887_v12 = vld [vmem:[%s5308_s5 + $0x60] sm:$0xff] }
 0x101   :  { %v4252_v42 = vadd.f32 %v202_v40, %v107_v52  ;;  %v204_v46 = vpop.f32.mrb[5].mxu1  ;;  %3425 = vpow2.f32 %v2650_v14 }
 0x102   :  { %v4254_v29 = vadd.f32 %v204_v46, %v111_v57 }
 0x104   :  { %v208_v34 = vpop.f32.mrb[6].mxu1 }
 0x105   :  { %v4256_v47 = vadd.f32 %v208_v34, %v107_v52  ;;  %v210_v51 = vpop.f32.mrb[7].mxu1 }
 0x106   :  { %v4258_v41 = vadd.f32 %v210_v51, %v111_v57  ;;  %v4288_v51 = vld [vmem:[%s5304_s1] sm:$0xff] }
 0x107   :  { %vm621_vm0 = vcmp.gt.f32.partialorder %v4288_v51, 0.0 }
 0x108   :  { %v214_v48 = vpop.f32.mrb[8].mxu1 }
 0x109   :  { %v4260_v53 = vadd.f32 %v214_v48, %v107_v52  ;;  %v216_v58 = vpop.f32.mrb[9].mxu1 }
 0x10a   :  { %v4262_v59 = vadd.f32 %v216_v58, %v111_v57  ;;  %v3424_v39 = vpop.eup %3423 }
 0x10b   :  { %v3426_v23 = vpop.eup %3425  ;;  %v605_v25 = vadd.f32 1.0, %v3424_v39  ;;  %v896_v39 = vld [vmem:[%s5308_s5 + $0xa8] sm:$0xff] }
 0x10c   :  { %v220_v56 = vpop.f32.mrb[10].mxu1  ;;  %v599_v28 = vadd.f32 1.0, %v3426_v23  ;;  %v4359_v19 = vpack.c.bf16 %v896_v39, %v892_v18  ;;  %v891_v23 = vld [vmem:[%s5308_s5 + $0x80] sm:$0xff]  ;;  %v932_v39 = vld [vmem:[%s5308_s5 + $0x1c8] sm:$0xff] }
 0x10d   :  { %v4264_v60 = vadd.f32 %v220_v56, %v107_v52  ;;  %v222_v62 = vpop.f32.mrb[11].mxu1  ;;  %3427 = vrcp.f32 %v605_v25  ;;  %v876_v56 = vld [vmem:[%s5308_s5 + $0x8] sm:$0xff]  ;;  %v895_v25 = vld [vmem:[%s5308_s5 + $0xa0] sm:$0xff] }
 0x10e   :  { %v4266_v1 = vadd.f32 %v222_v62, %v111_v57  ;;  %3429 = vrcp.f32 %v599_v28  ;;  %v880_v62 = vld [vmem:[%s5308_s5 + $0x28] sm:$0xff]  ;;  %v4367_v28 = vpack.c.bf16 %v895_v25, %v891_v23  ;;  %v927_v18 = vld [vmem:[%s5308_s5 + $0x1a0] sm:$0xff] }
 0x10f   :  { %v936_v23 = vld [vmem:[%s5308_s5 + $0x1e8] sm:$0xff] }
 0x110   :  { %v226_v63 = vpop.f32.mrb[12].mxu1 }
 0x111   :  { %v4268_v2 = vadd.f32 %v226_v63, %v107_v52  ;;  %v228_v22 = vpop.f32.mrb[13].mxu1  ;;  %v4323_v63 = vpack.c.bf16 %v880_v62, %v876_v56  ;;  %v915_v62 = vld [vmem:[%s5308_s5 + $0x140] sm:$0xff] }
 0x112   :  { %v4270_v4 = vadd.f32 %v228_v22, %v111_v57  ;;  %v888_v22 = vld [vmem:[%s5308_s5 + $0x68] sm:$0xff] }
 0x113   :  { %2942 = vmatprep.subr.bf16.mxu0 %v4323_v63 }
 0x114   :  { %v232_v6 = vpop.f32.mrb[14].mxu1 }
 0x115   :  { %v4272_v8 = vadd.f32 %v232_v6, %v107_v52  ;;  %v234_v26 = vpop.f32.mrb[15].mxu1 }
 0x116   :  { %v4274_v35 = vadd.f32 %v234_v26, %v111_v57  ;;  %v883_v26 = vld [vmem:[%s5308_s5 + $0x40] sm:$0xff] }
 0x117   :  { %v3428_v5 = vpop.eup %3427  ;;  %v4349_v14 = vpack.c.bf16 %v887_v12, %v883_v26  ;;  %v923_v12 = vld [vmem:[%s5308_s5 + $0x180] sm:$0xff] }
 0x118   :  { %v3430_v21 = vpop.eup %3429  ;;  %v615_v36 = vmul.f32 0.0, %v3428_v5  ;;  %v4445_v25 = vpack.c.bf16 %v927_v18, %v923_v12 }
 0x138   :  { %v587_v31 = vpop.f32.mrb[16].mxu1 }
 0x139   :  { %v3389_v52 = vadd.f32 %v587_v31, %v4276_v27  ;;  %v589_v57 = vpop.f32.mrb[17].mxu1  ;;  %v900_v31 = vld [vmem:[%s5308_s5 + $0xc8] sm:$0xff] }
 0x13a   :  { %v3390_v32 = vadd.f32 %v589_v57, %v4278_v30 }
 0x13b   :  { %3431 = vtanh.f32 %v3389_v52  ;;  %v904_v52 = vld [vmem:[%s5308_s5 + $0xe8] sm:$0xff] }
 0x13c   :  { %v2652_v0 = vmul.f32 -1.442695, %v3390_v32  ;;  %v4377_v57 = vpack.c.bf16 %v904_v52, %v900_v31  ;;  %v899_v32 = vld [vmem:[%s5308_s5 + $0xc0] sm:$0xff]  ;;  %v4448_v31 = vpack.c.bf16 %v936_v23, %v932_v39 }
 0x13d   :  { %v931_v52 = vld [vmem:[%s5308_s5 + $0x1c0] sm:$0xff] }
 0x13e   :  { %3433 = vpow2.f32 %v2652_v0  ;;  %v903_v0 = vld [vmem:[%s5308_s5 + $0xe0] sm:$0xff] }
 0x13f   :  { %v4385_v5 = vpack.c.bf16 %v903_v0, %v899_v32  ;;  %v935_v32 = vld [vmem:[%s5308_s5 + $0x1e0] sm:$0xff] }
 0x140   :  { %v4457_v0 = vpack.c.bf16 %v935_v32, %v931_v52 }
 0x145   :  { %v3432_v33 = vpop.eup %3431 }
 0x146   :  { %v616_v15 = vmul.f32 %v3432_v33, %v3430_v21  ;;  %v908_v21 = vld [vmem:[%s5308_s5 + $0x108] sm:$0xff] }
 0x147   :  { %v912_v33 = vld [vmem:[%s5308_s5 + $0x128] sm:$0xff] }
 0x148   :  { %v3434_v40 = vpop.eup %3433  ;;  %v4282_v46 = vadd.f32 %v616_v15, %v615_v36  ;;  %v907_v36 = vld [vmem:[%s5308_s5 + $0x100] sm:$0xff]  ;;  %v4398_v15 = vpack.c.bf16 %v912_v33, %v908_v21 }
 0x149   :  { %v612_v24 = vadd.f32 1.0, %v3434_v40  ;;  %v911_v40 = vld [vmem:[%s5308_s5 + $0x120] sm:$0xff] }
 0x14a   :  { %3435 = vtanh.f32 %v4282_v46 }
 0x14b   :  { %3437 = vrcp.f32 %v612_v24  ;;  %v916_v24 = vld [vmem:[%s5308_s5 + $0x148] sm:$0xff] }
 0x154   :  { %v3436_v34 = vpop.eup %3435 }
 0x155   :  { %v3438_v48 = vpop.eup %3437 }
 0x156   :  { %v4290_v58 = vmul.f32 %v3438_v48, %v3436_v34  ;;  %v920_v34 = vld [vmem:[%s5308_s5 + $0x168] sm:$0xff]  ;;  %v4409_v48 = vpack.c.bf16 %v911_v40, %v907_v36 }
 0x157   :  { %v4411_v56 = vpack.c.bf16 %v920_v34, %v916_v24 }
 0x158   :  { %2653 = vmatmul.mubr.msk.f32.vlgmr.msra.gmra.mrb[2].mxu0 %vm621_vm0, %v4290_v58  ;;  %2654 = vmatmul.mubr.msk.f32.vlgmr.msra.gmra.mrb[18].mxu1 %vm621_vm0, %v4290_v58 }
 0x159   :  { %2976 = vmatpush1.bf16.msra.mxu1 %v4085_v43  ;;  %1003 = vmatprep.mubr.f32.mxu0 %v5312_v7 }
 0x15a   :  { %2978 = vmatprep.subr.bf16.mxu1 %v4088_v45  ;;  %1074 = vmatprep.mubr.f32.mxu1 %v5312_v7 }
 0x15d   :  { %2980 = vmatpush1.bf16.msra.mxu1 %v4106_v49 }
 0x15e   :  { %2982 = vmatprep.subr.bf16.mxu1 %v4109_v50 }
 0x161   :  { %2984 = vmatpush1.bf16.msra.mxu1 %v4126_v54 }
 0x162   :  { %2986 = vmatprep.subr.bf16.mxu1 %v4129_v55 }
 0x165   :  { %2988 = vmatpush1.bf16.msra.mxu1 %v4146_v9 }
 0x166   :  { %2990 = vmatprep.subr.bf16.mxu1 %v4149_v61 }
 0x169   :  { %2992 = vmatpush1.bf16.msra.mxu1 %v4166_v13 }
 0x16a   :  { %2994 = vmatprep.subr.bf16.mxu1 %v4169_v3 }
 0x16d   :  { %2996 = vmatpush1.bf16.msra.mxu1 %v4186_v10 }
 0x16e   :  { %2998 = vmatprep.subr.bf16.mxu1 %v4189_v11 }
 0x171   :  { %3000 = vmatpush1.bf16.msra.mxu1 %v4206_v16  ;;  %v875_v16 = vld [vmem:[%s5308_s5] sm:$0xff] }
 0x172   :  { %3002 = vmatprep.subr.bf16.mxu1 %v4209_v17  ;;  %v879_v17 = vld [vmem:[%s5308_s5 + $0x20] sm:$0xff] }
 0x175   :  { %3004 = vmatpush1.bf16.msra.mxu1 %v4220_v44  ;;  %v4331_v44 = vpack.c.bf16 %v879_v17, %v875_v16  ;;  %v919_v16 = vld [vmem:[%s5308_s5 + $0x160] sm:$0xff]  ;;  %v924_v17 = vld [vmem:[%s5308_s5 + $0x188] sm:$0xff] }
 0x176   :  { %3038 = vmatprep.subr.bf16.mxu1 %v4067_v38  ;;  %v884_v38 = vld [vmem:[%s5308_s5 + $0x48] sm:$0xff] }
 0x177   :  { %2944 = vmatpush1.bf16.msra.mxu0 %v4331_v44  ;;  %v4341_v6 = vpack.c.bf16 %v888_v22, %v884_v38  ;;  %v928_v38 = vld [vmem:[%s5308_s5 + $0x1a8] sm:$0xff]  ;;  %v4427_v22 = vpack.c.bf16 %v919_v16, %v915_v62 }
 0x178   :  { %v4430_v26 = vpack.c.bf16 %v928_v38, %v924_v17 }
 0x179   :  { %2946 = vmatprep.subr.bf16.mxu0 %v4341_v6 }
 0x17b   :  { %2948 = vmatpush1.bf16.msra.mxu0 %v4349_v14 }
 0x17c   :  { %2950 = vmatprep.subr.bf16.mxu0 %v4359_v19 }
 0x17f   :  { %2952 = vmatpush1.bf16.msra.mxu0 %v4367_v28 }
 0x180   :  { %2954 = vmatprep.subr.bf16.mxu0 %v4377_v57 }
 0x183   :  { %2956 = vmatpush1.bf16.msra.mxu0 %v4385_v5 }
 0x184   :  { %2958 = vmatprep.subr.bf16.mxu0 %v4398_v15 }
 0x187   :  { %2960 = vmatpush1.bf16.msra.mxu0 %v4409_v48 }
 0x188   :  { %2962 = vmatprep.subr.bf16.mxu0 %v4411_v56 }
 0x18b   :  { %2964 = vmatpush1.bf16.msra.mxu0 %v4427_v22 }
 0x18c   :  { %2966 = vmatprep.subr.bf16.mxu0 %v4430_v26 }
 0x18f   :  { %2968 = vmatpush1.bf16.msra.mxu0 %v4445_v25 }
 0x190   :  { %2970 = vmatprep.subr.bf16.mxu0 %v4448_v31 }
 0x193   :  { %2972 = vmatpush1.bf16.msra.mxu0 %v4457_v0 }
 0x194   :  { %3006 = vmatprep.subr.bf16.mxu0 %v4323_v63 }
 0x22b   :  { %v760_v21 = vpop.f32.mrb[2].mxu0  ;;  %v831_v33 = vpop.f32.mrb[18].mxu1 }
 0x22c   :  { %v836_v36 = vadd.f32 %v760_v21, %v4248_v37  ;;  %v762_v40 = vpop.f32.mrb[3].mxu0  ;;  %v833_v24 = vpop.f32.mrb[19].mxu1  ;;  %v3391_v12 = vadd.f32 %v831_v33, %v4276_v27  ;;  %v4469_v21 = vld [vmem:[%s5304_s1 + $0x8] sm:$0xff]  ;;  %v623_v33 = vsel %vm621_vm0, %v4282_v46, 0.0 }
 0x22d   :  { %v837_v34 = vadd.f32 %v762_v40, %v4250_v20  ;;  %v3392_v17 = vadd.f32 %v833_v24, %v4278_v30  ;;  %vm865_vm1 = vcmp.gt.f32.partialorder %v4469_v21, 0.0 }
 0x22e   :  { %v2655_v62 = vmul.f32 -1.442695, %v836_v36 }
 0x22f   :  { %v2656_v16 = vmul.f32 -1.442695, %v837_v34  ;;  %v2657_v38 = vmul.f32 -1.442695, %v3392_v17 }
 0x230   :  { %3439 = vpow2.f32 %v2655_v62 }
 0x231   :  { %3441 = vpow2.f32 %v2656_v16 }
 0x232   :  { %3443 = vpow2.f32 %v2657_v38 }
 0x233   :  { %3445 = vtanh.f32 %v3391_v12 }
 0x23a   :  { %v3440_v18 = vpop.eup %3439 }
 0x23b   :  { %v3442_v39 = vpop.eup %3441  ;;  %v843_v23 = vadd.f32 1.0, %v3440_v18  ;;  %v622_v18 = vsel %vm621_vm0, %v4290_v58, 0.0 }
 0x23c   :  { %v849_v52 = vadd.f32 1.0, %v3442_v39  ;;  %v3444_v37 = vpop.eup %3443 }
 0x23d   :  { %3447 = vrcp.f32 %v843_v23  ;;  %v3446_v32 = vpop.eup %3445  ;;  %v856_v24 = vadd.f32 1.0, %v3444_v37 }
 0x23e   :  { %3449 = vrcp.f32 %v849_v52 }
 0x23f   :  { %3451 = vrcp.f32 %v856_v24 }
 0x247   :  { %v3448_v20 = vpop.eup %3447 }
 0x248   :  { %v3450_v36 = vpop.eup %3449  ;;  %v860_v40 = vmul.f32 %v3448_v20, %v3446_v32 }
 0x249   :  { %v859_v34 = vmul.f32 %v3450_v36, %v623_v33  ;;  %v3452_v17 = vpop.eup %3451 }
 0x24b   :  { %v861_v62 = vadd.f32 %v860_v40, %v859_v34 }
 0x24d   :  { %3453 = vtanh.f32 %v861_v62  ;;  %v4477_v16 = vsel %vm865_vm1, %v861_v62, %v623_v33 }
 0x257   :  { %v3454_v38 = vpop.eup %3453 }
 0x258   :  { %v4479_v12 = vmul.f32 %v3454_v38, %v3452_v17  ;;  %v4555_v38 = vld [vmem:[%s5304_s1 + $0x10] sm:$0xff] }
 0x259   :  { %5318 = vst [vmem:[#allocation7_spill] sm:$0xff] %v4555_v38  ;;  %vm1110_vm2 = vcmp.gt.f32.partialorder %v4555_v38, 0.0 }
 0x25a   :  { %v4487_v46 = vsel %vm865_vm1, %v4479_v12, %v622_v18 }
 0x25b   :  { %1004 = vmatmul.mubr.f32.vlgmr.msra.gmra.mrb[4].mxu0 %v4487_v46  ;;  %1075 = vmatmul.mubr.f32.vlgmr.msra.gmra.mrb[20].mxu1 %v4487_v46 }
 0x25c   :  { %3008 = vmatpush1.bf16.msra.mxu0 %v4331_v44  ;;  %3040 = vmatpush1.bf16.msra.mxu1 %v4085_v43  ;;  %v1170_v43 = vld [vmem:[%s5308_s5 + $0x190] sm:$0xff] }
 0x25d   :  { %3010 = vmatprep.subr.bf16.mxu0 %v4341_v6  ;;  %3042 = vmatprep.subr.bf16.mxu1 %v4088_v45  ;;  %v1174_v45 = vld [vmem:[%s5308_s5 + $0x1b0] sm:$0xff] }
 0x25e   :  { %1248 = vmatprep.mubr.f32.mxu0 %v5312_v7  ;;  %1319 = vmatprep.mubr.f32.mxu1 %v5312_v7 }
 0x260   :  { %3012 = vmatpush1.bf16.msra.mxu0 %v4349_v14  ;;  %3044 = vmatpush1.bf16.msra.mxu1 %v4106_v49  ;;  %v1179_v49 = vld [vmem:[%s5308_s5 + $0x1d8] sm:$0xff] }
 0x261   :  { %3014 = vmatprep.subr.bf16.mxu0 %v4359_v19  ;;  %3046 = vmatprep.subr.bf16.mxu1 %v4109_v50  ;;  %v4530_v50 = vpack.c.bf16 %v1174_v45, %v1170_v43 }
 0x264   :  { %3016 = vmatpush1.bf16.msra.mxu0 %v4367_v28  ;;  %3048 = vmatpush1.bf16.msra.mxu1 %v4126_v54  ;;  %v1183_v54 = vld [vmem:[%s5308_s5 + $0x1f8] sm:$0xff] }
 0x265   :  { %3018 = vmatprep.subr.bf16.mxu0 %v4377_v57  ;;  %3050 = vmatprep.subr.bf16.mxu1 %v4129_v55  ;;  %v1178_v55 = vld [vmem:[%s5308_s5 + $0x1d0] sm:$0xff] }
 0x268   :  { %3020 = vmatpush1.bf16.msra.mxu0 %v4385_v5  ;;  %3052 = vmatpush1.bf16.msra.mxu1 %v4146_v9  ;;  %v1182_v9 = vld [vmem:[%s5308_s5 + $0x1f0] sm:$0xff] }
 0x269   :  { %3022 = vmatprep.subr.bf16.mxu0 %v4398_v15  ;;  %3054 = vmatprep.subr.bf16.mxu1 %v4149_v61  ;;  %v4541_v61 = vpack.c.bf16 %v1183_v54, %v1179_v49 }
 0x26c   :  { %3024 = vmatpush1.bf16.msra.mxu0 %v4409_v48  ;;  %3056 = vmatpush1.bf16.msra.mxu1 %v4166_v13  ;;  %v4544_v13 = vpack.c.bf16 %v1182_v9, %v1178_v55 }
 0x26d   :  { %3026 = vmatprep.subr.bf16.mxu0 %v4411_v56  ;;  %3058 = vmatprep.subr.bf16.mxu1 %v4169_v3 }
 0x270   :  { %3028 = vmatpush1.bf16.msra.mxu0 %v4427_v22  ;;  %3060 = vmatpush1.bf16.msra.mxu1 %v4186_v10 }
 0x271   :  { %3030 = vmatprep.subr.bf16.mxu0 %v4430_v26  ;;  %3062 = vmatprep.subr.bf16.mxu1 %v4189_v11 }
 0x274   :  { %3032 = vmatpush1.bf16.msra.mxu0 %v4445_v25  ;;  %3064 = vmatpush1.bf16.msra.mxu1 %v4530_v50 }
 0x275   :  { %3034 = vmatprep.subr.bf16.mxu0 %v4448_v31  ;;  %3066 = vmatprep.subr.bf16.mxu1 %v4541_v61 }
 0x278   :  { %3036 = vmatpush1.bf16.msra.mxu0 %v4457_v0  ;;  %3068 = vmatpush1.bf16.msra.mxu1 %v4544_v13 }
 0x279   :  { %3070 = vmatprep.subr.bf16.mxu0 %v4323_v63 }
 0x32e   :  { %v1005_v3 = vpop.f32.mrb[4].mxu0  ;;  %v1076_v10 = vpop.f32.mrb[20].mxu1 }
 0x32f   :  { %v1081_v11 = vadd.f32 %v1005_v3, %v4252_v42  ;;  %v1007_v39 = vpop.f32.mrb[5].mxu0  ;;  %v1078_v23 = vpop.f32.mrb[21].mxu1  ;;  %v3393_v40 = vadd.f32 %v1076_v10, %v4276_v27 }
 0x330   :  { %v1082_v52 = vadd.f32 %v1007_v39, %v4254_v29  ;;  %v3394_v20 = vadd.f32 %v1078_v23, %v4278_v30  ;;  %v1367_v23 = vld [vmem:[%s5308_s5 + $0x10] sm:$0xff] }
 0x331   :  { %v2658_v37 = vmul.f32 -1.442695, %v1081_v11 }
 0x332   :  { %v2659_v32 = vmul.f32 -1.442695, %v1082_v52  ;;  %v2660_v36 = vmul.f32 -1.442695, %v3394_v20  ;;  %v1371_v52 = vld [vmem:[%s5308_s5 + $0x30] sm:$0xff] }
 0x333   :  { %3455 = vpow2.f32 %v2658_v37  ;;  %v4606_v37 = vpack.c.bf16 %v1371_v52, %v1367_v23  ;;  %v1403_v52 = vld [vmem:[%s5308_s5 + $0x130] sm:$0xff] }
 0x334   :  { %3457 = vpow2.f32 %v2659_v32  ;;  %v1380_v32 = vld [vmem:[%s5308_s5 + $0x78] sm:$0xff] }
 0x335   :  { %3459 = vpow2.f32 %v2660_v36  ;;  %v1375_v36 = vld [vmem:[%s5308_s5 + $0x50] sm:$0xff] }
 0x336   :  { %3461 = vtanh.f32 %v3393_v40  ;;  %v1379_v40 = vld [vmem:[%s5308_s5 + $0x70] sm:$0xff] }
 0x33d   :  { %v3456_v24 = vpop.eup %3455 }
 0x33e   :  { %v3458_v33 = vpop.eup %3457  ;;  %v1088_v34 = vadd.f32 1.0, %v3456_v24  ;;  %v4624_v24 = vpack.c.bf16 %v1379_v40, %v1375_v36 }
 0x33f   :  { %v1094_v62 = vadd.f32 1.0, %v3458_v33  ;;  %v3460_v42 = vpop.eup %3459  ;;  %v1384_v33 = vld [vmem:[%s5308_s5 + $0x98] sm:$0xff] }
 0x340   :  { %3463 = vrcp.f32 %v1088_v34  ;;  %v3462_v17 = vpop.eup %3461  ;;  %v1101_v45 = vadd.f32 1.0, %v3460_v42  ;;  %v1388_v34 = vld [vmem:[%s5308_s5 + $0xb8] sm:$0xff]  ;;  %v1383_v42 = vld [vmem:[%s5308_s5 + $0x90] sm:$0xff] }
 0x341   :  { %3465 = vrcp.f32 %v1094_v62  ;;  %v4634_v62 = vpack.c.bf16 %v1388_v34, %v1384_v33  ;;  %v1407_v33 = vld [vmem:[%s5308_s5 + $0x150] sm:$0xff] }
 0x342   :  { %3467 = vrcp.f32 %v1101_v45  ;;  %v1411_v34 = vld [vmem:[%s5308_s5 + $0x170] sm:$0xff] }
 0x34a   :  { %v3464_v29 = vpop.eup %3463 }
 0x34b   :  { %v3466_v18 = vpop.eup %3465  ;;  %v1105_v43 = vmul.f32 %v3464_v29, %v3462_v17  ;;  %v1387_v17 = vld [vmem:[%s5308_s5 + $0xb0] sm:$0xff] }
 0x34c   :  { %v1104_v49 = vmul.f32 %v3466_v18, %v4477_v16  ;;  %v3468_v9 = vpop.eup %3467  ;;  %v4642_v29 = vpack.c.bf16 %v1387_v17, %v1383_v42  ;;  %v1392_v18 = vld [vmem:[%s5308_s5 + $0xd8] sm:$0xff] }
 0x34d   :  { %v1416_v42 = vld [vmem:[%s5308_s5 + $0x198] sm:$0xff] }
 0x34e   :  { %v1106_v54 = vadd.f32 %v1105_v43, %v1104_v49  ;;  %v1396_v43 = vld [vmem:[%s5308_s5 + $0xf8] sm:$0xff]  ;;  %v1391_v49 = vld [vmem:[%s5308_s5 + $0xd0] sm:$0xff] }
 0x34f   :  { %v4652_v45 = vpack.c.bf16 %v1396_v43, %v1392_v18  ;;  %v1420_v17 = vld [vmem:[%s5308_s5 + $0x1b8] sm:$0xff]  ;;  %v4702_v18 = vpack.c.bf16 %v1411_v34, %v1407_v33 }
 0x350   :  { %3469 = vtanh.f32 %v1106_v54  ;;  %v4562_v55 = vsel %vm1110_vm2, %v1106_v54, %v4477_v16  ;;  %v1368_v16 = vld [vmem:[%s5308_s5 + $0x18] sm:$0xff]  ;;  %v1395_v54 = vld [vmem:[%s5308_s5 + $0xf0] sm:$0xff]  ;;  %v4705_v43 = vpack.c.bf16 %v1420_v17, %v1416_v42 }
 0x35a   :  { %v3470_v3 = vpop.eup %3469 }
 0x35b   :  { %v4564_v10 = vmul.f32 %v3470_v3, %v3468_v9  ;;  %v4660_v9 = vpack.c.bf16 %v1395_v54, %v1391_v49  ;;  %v1400_v3 = vld [vmem:[%s5308_s5 + $0x118] sm:$0xff] }
 0x35d   :  { %5319 = vst [vmem:[#allocation8_spill] sm:$0xff] %v4564_v10  ;;  %v4570_v11 = vsel %vm1110_vm2, %v4564_v10, %v4487_v46  ;;  %v1372_v46 = vld [vmem:[%s5308_s5 + $0x38] sm:$0xff] }
 0x35e   :  { %1249 = vmatmul.mubr.f32.vlgmr.msra.gmra.mrb[6].mxu0 %v4570_v11  ;;  %1320 = vmatmul.mubr.f32.vlgmr.msra.gmra.mrb[22].mxu1 %v4570_v11  ;;  %v4598_v39 = vpack.c.bf16 %v1372_v46, %v1368_v16  ;;  %v1404_v16 = vld [vmem:[%s5308_s5 + $0x138] sm:$0xff]  ;;  %v1399_v46 = vld [vmem:[%s5308_s5 + $0x110] sm:$0xff] }
 0x35f   :  { %3072 = vmatpush1.bf16.msra.mxu0 %v4331_v44  ;;  %1493 = vmatprep.mubr.f32.mxu0 %v5312_v7  ;;  %v4673_v23 = vpack.c.bf16 %v1404_v16, %v1400_v3  ;;  %v4684_v36 = vpack.c.bf16 %v1403_v52, %v1399_v46 }
 0x360   :  { %3074 = vmatprep.subr.bf16.mxu0 %v4341_v6  ;;  %1564 = vmatprep.mubr.f32.mxu1 %v5312_v7 }
 0x361   :  { %3102 = vmatprep.subr.bf16.mxu1 %v4598_v39 }
 0x362   :  { %3104 = vmatpush1.bf16.msra.mxu1 %v4606_v37 }
 0x363   :  { %3076 = vmatpush1.bf16.msra.mxu0 %v4349_v14 }
 0x364   :  { %3078 = vmatprep.subr.bf16.mxu0 %v4359_v19 }
 0x367   :  { %3080 = vmatpush1.bf16.msra.mxu0 %v4367_v28 }
 0x368   :  { %3082 = vmatprep.subr.bf16.mxu0 %v4377_v57 }
 0x36b   :  { %3084 = vmatpush1.bf16.msra.mxu0 %v4385_v5 }
 0x36c   :  { %3086 = vmatprep.subr.bf16.mxu0 %v4398_v15 }
 0x36f   :  { %3088 = vmatpush1.bf16.msra.mxu0 %v4409_v48 }
 0x370   :  { %3090 = vmatprep.subr.bf16.mxu0 %v4411_v56 }
 0x373   :  { %3092 = vmatpush1.bf16.msra.mxu0 %v4427_v22 }
 0x374   :  { %3094 = vmatprep.subr.bf16.mxu0 %v4430_v26 }
 0x377   :  { %3096 = vmatpush1.bf16.msra.mxu0 %v4445_v25 }
 0x378   :  { %3098 = vmatprep.subr.bf16.mxu0 %v4448_v31 }
 0x37b   :  { %3100 = vmatpush1.bf16.msra.mxu0 %v4457_v0 }
 0x37c   :  { %3134 = vmatprep.subr.bf16.mxu0 %v4323_v63  ;;  %v1376_v63 = vld [vmem:[%s5308_s5 + $0x58] sm:$0xff] }
 0x37d   :  { %v4616_v20 = vpack.c.bf16 %v1380_v32, %v1376_v63  ;;  %v1408_v63 = vld [vmem:[%s5308_s5 + $0x158] sm:$0xff] }
 0x37e   :  { %v1412_v32 = vld [vmem:[%s5308_s5 + $0x178] sm:$0xff] }
 0x37f   :  { %3106 = vmatprep.subr.bf16.mxu1 %v4616_v20  ;;  %v4686_v40 = vpack.c.bf16 %v1412_v32, %v1408_v63 }
 0x380   :  { %3108 = vmatpush1.bf16.msra.mxu1 %v4624_v24 }
 0x381   :  { %3110 = vmatprep.subr.bf16.mxu1 %v4634_v62 }
 0x384   :  { %3112 = vmatpush1.bf16.msra.mxu1 %v4642_v29 }
 0x385   :  { %3114 = vmatprep.subr.bf16.mxu1 %v4652_v45 }
 0x388   :  { %3116 = vmatpush1.bf16.msra.mxu1 %v4660_v9 }
 0x389   :  { %3118 = vmatprep.subr.bf16.mxu1 %v4673_v23 }
 0x38c   :  { %3120 = vmatpush1.bf16.msra.mxu1 %v4684_v36 }
 0x38d   :  { %3122 = vmatprep.subr.bf16.mxu1 %v4686_v40 }
 0x390   :  { %3124 = vmatpush1.bf16.msra.mxu1 %v4702_v18 }
 0x391   :  { %3126 = vmatprep.subr.bf16.mxu1 %v4705_v43 }
 0x394   :  { %3128 = vmatpush1.bf16.msra.mxu1 %v4530_v50 }
 0x395   :  { %3130 = vmatprep.subr.bf16.mxu1 %v4541_v61 }
 0x398   :  { %3132 = vmatpush1.bf16.msra.mxu1 %v4544_v13 }
 0x399   :  { %3166 = vmatprep.subr.bf16.mxu1 %v4598_v39 }
 0x431   :  { %v1250_v49 = vpop.f32.mrb[6].mxu0  ;;  %v1321_v54 = vpop.f32.mrb[22].mxu1 }
 0x432   :  { %v1326_v3 = vadd.f32 %v1250_v49, %v4256_v47  ;;  %v1252_v16 = vpop.f32.mrb[7].mxu0  ;;  %v1323_v46 = vpop.f32.mrb[23].mxu1  ;;  %v3395_v42 = vadd.f32 %v1321_v54, %v4276_v27 }
 0x433   :  { %v1327_v52 = vadd.f32 %v1252_v16, %v4258_v41  ;;  %v3396_v33 = vadd.f32 %v1323_v46, %v4278_v30 }
 0x434   :  { %v2661_v63 = vmul.f32 -1.442695, %v1326_v3  ;;  %v4720_v3 = vld [vmem:[%s5304_s1 + $0x18] sm:$0xff] }
 0x435   :  { %v2662_v32 = vmul.f32 -1.442695, %v1327_v52  ;;  %v2663_v34 = vmul.f32 -1.442695, %v3396_v33  ;;  %vm1355_vm3 = vcmp.gt.f32.partialorder %v4720_v3, 0.0 }
 0x436   :  { %3471 = vpow2.f32 %v2661_v63 }
 0x437   :  { %3473 = vpow2.f32 %v2662_v32 }
 0x438   :  { %3475 = vpow2.f32 %v2663_v34  ;;  %v4779_v34 = vld [vmem:[%s5304_s1 + $0x20] sm:$0xff] }
 0x439   :  { %3477 = vtanh.f32 %v3395_v42  ;;  %vm1600_vm4 = vcmp.gt.f32.partialorder %v4779_v34, 0.0 }
 0x440   :  { %v3472_v17 = vpop.eup %3471 }
 0x441   :  { %v3474_v7 = vpop.eup %3473  ;;  %v1333_v38 = vadd.f32 1.0, %v3472_v17 }
 0x442   :  { %v1339_v10 = vadd.f32 1.0, %v3474_v7  ;;  %v3476_v47 = vpop.eup %3475 }
 0x443   :  { %3479 = vrcp.f32 %v1333_v38  ;;  %v3478_v49 = vpop.eup %3477  ;;  %v1346_v52 = vadd.f32 1.0, %v3476_v47 }
 0x444   :  { %3481 = vrcp.f32 %v1339_v10 }
 0x445   :  { %3483 = vrcp.f32 %v1346_v52 }
 0x44d   :  { %v3480_v41 = vpop.eup %3479 }
 0x44e   :  { %v3482_v16 = vpop.eup %3481  ;;  %v1350_v46 = vmul.f32 %v3480_v41, %v3478_v49 }
 0x44f   :  { %v1349_v54 = vmul.f32 %v3482_v16, %v4562_v55  ;;  %v3484_v38 = vpop.eup %3483 }
 0x451   :  { %v1351_v63 = vadd.f32 %v1350_v46, %v1349_v54 }
 0x453   :  { %3485 = vtanh.f32 %v1351_v63  ;;  %v4727_v7 = vsel %vm1355_vm3, %v1351_v63, %v4562_v55  ;;  %v5320_v55 = vmov 0.0  }
 0x45d   :  { %v3486_v10 = vpop.eup %3485 }
 0x45e   :  { %v4729_v32 = vmul.f32 %v3486_v10, %v3484_v38  ;;  %v1860_v38 = vld [vmem:[%s5308_s5 + $0x28] sm:$0xff] }
 0x460   :  { %v4735_v33 = vsel %vm1355_vm3, %v4729_v32, %v4570_v11 }
 0x461   :  { %1494 = vmatmul.mubr.f32.vlgmr.msra.gmra.mrb[8].mxu0 %v4735_v33  ;;  %1565 = vmatmul.mubr.f32.vlgmr.msra.gmra.mrb[24].mxu1 %v4735_v33 }
 0x462   :  { %3136 = vmatpush1.bf16.msra.mxu0 %v4331_v44  ;;  %3168 = vmatpush1.bf16.msra.mxu1 %v4606_v37 }
 0x463   :  { %3138 = vmatprep.subr.bf16.mxu0 %v4341_v6  ;;  %3170 = vmatprep.subr.bf16.mxu1 %v4616_v20 }
 0x464   :  { %1738 = vmatprep.mubr.f32.mxu0 %v5320_v55  ;;  %1809 = vmatprep.mubr.f32.mxu1 %v5320_v55 }
 0x466   :  { %3140 = vmatpush1.bf16.msra.mxu0 %v4349_v14  ;;  %3172 = vmatpush1.bf16.msra.mxu1 %v4624_v24 }
 0x467   :  { %3142 = vmatprep.subr.bf16.mxu0 %v4359_v19  ;;  %3174 = vmatprep.subr.bf16.mxu1 %v4634_v62 }
 0x46a   :  { %3144 = vmatpush1.bf16.msra.mxu0 %v4367_v28  ;;  %3176 = vmatpush1.bf16.msra.mxu1 %v4642_v29 }
 0x46b   :  { %3146 = vmatprep.subr.bf16.mxu0 %v4377_v57  ;;  %3178 = vmatprep.subr.bf16.mxu1 %v4652_v45 }
 0x46e   :  { %3148 = vmatpush1.bf16.msra.mxu0 %v4385_v5  ;;  %3180 = vmatpush1.bf16.msra.mxu1 %v4660_v9 }
 0x46f   :  { %3150 = vmatprep.subr.bf16.mxu0 %v4398_v15  ;;  %3182 = vmatprep.subr.bf16.mxu1 %v4673_v23 }
 0x472   :  { %3152 = vmatpush1.bf16.msra.mxu0 %v4409_v48  ;;  %3184 = vmatpush1.bf16.msra.mxu1 %v4684_v36 }
 0x473   :  { %3154 = vmatprep.subr.bf16.mxu0 %v4411_v56  ;;  %3186 = vmatprep.subr.bf16.mxu1 %v4686_v40 }
 0x476   :  { %3156 = vmatpush1.bf16.msra.mxu0 %v4427_v22  ;;  %3188 = vmatpush1.bf16.msra.mxu1 %v4702_v18 }
 0x477   :  { %3158 = vmatprep.subr.bf16.mxu0 %v4430_v26  ;;  %3190 = vmatprep.subr.bf16.mxu1 %v4705_v43 }
 0x47a   :  { %3160 = vmatpush1.bf16.msra.mxu0 %v4445_v25  ;;  %3192 = vmatpush1.bf16.msra.mxu1 %v4530_v50 }
 0x47b   :  { %3162 = vmatprep.subr.bf16.mxu0 %v4448_v31  ;;  %3194 = vmatprep.subr.bf16.mxu1 %v4541_v61 }
 0x47e   :  { %3164 = vmatpush1.bf16.msra.mxu0 %v4457_v0  ;;  %3196 = vmatpush1.bf16.msra.mxu1 %v4544_v13 }
 0x47f   :  { %3230 = vmatprep.subr.bf16.mxu1 %v4598_v39 }
 0x534   :  { %v1495_v44 = vpop.f32.mrb[8].mxu0  ;;  %v1566_v6 = vpop.f32.mrb[24].mxu1 }
 0x535   :  { %v1571_v14 = vadd.f32 %v1495_v44, %v4260_v53  ;;  %v1497_v19 = vpop.f32.mrb[9].mxu0  ;;  %v1568_v28 = vpop.f32.mrb[25].mxu1  ;;  %v3397_v22 = vadd.f32 %v1566_v6, %v4276_v27  ;;  %v1863_v6 = vld [vmem:[%s5308_s5 + $0x40] sm:$0xff] }
 0x536   :  { %v1572_v57 = vadd.f32 %v1497_v19, %v4262_v59  ;;  %v3398_v48 = vadd.f32 %v1568_v28, %v4278_v30  ;;  %v1872_v28 = vld [vmem:[%s5308_s5 + $0x88] sm:$0xff] }
 0x537   :  { %v2664_v5 = vmul.f32 -1.442695, %v1571_v14  ;;  %v1867_v14 = vld [vmem:[%s5308_s5 + $0x60] sm:$0xff] }
 0x538   :  { %v2665_v15 = vmul.f32 -1.442695, %v1572_v57  ;;  %v2666_v56 = vmul.f32 -1.442695, %v3398_v48  ;;  %v4845_v19 = vpack.c.bf16 %v1867_v14, %v1863_v6  ;;  %v1876_v57 = vld [vmem:[%s5308_s5 + $0xa8] sm:$0xff]  ;;  %v1875_v48 = vld [vmem:[%s5308_s5 + $0xa0] sm:$0xff] }
 0x539   :  { %3487 = vpow2.f32 %v2664_v5  ;;  %v4855_v5 = vpack.c.bf16 %v1876_v57, %v1872_v28  ;;  %v1903_v6 = vld [vmem:[%s5308_s5 + $0x180] sm:$0xff]  ;;  %v1912_v28 = vld [vmem:[%s5308_s5 + $0x1c8] sm:$0xff] }
 0x53a   :  { %3489 = vpow2.f32 %v2665_v15  ;;  %v1871_v15 = vld [vmem:[%s5308_s5 + $0x80] sm:$0xff]  ;;  %v1916_v57 = vld [vmem:[%s5308_s5 + $0x1e8] sm:$0xff] }
 0x53b   :  { %3491 = vpow2.f32 %v2666_v56  ;;  %v4863_v56 = vpack.c.bf16 %v1875_v48, %v1871_v15  ;;  %v1907_v14 = vld [vmem:[%s5308_s5 + $0x1a0] sm:$0xff]  ;;  %v4944_v48 = vpack.c.bf16 %v1916_v57, %v1912_v28 }
 0x53c   :  { %3493 = vtanh.f32 %v3397_v22  ;;  %v1880_v22 = vld [vmem:[%s5308_s5 + $0xc8] sm:$0xff]  ;;  %v4941_v15 = vpack.c.bf16 %v1907_v14, %v1903_v6 }
 0x543   :  { %v3488_v26 = vpop.eup %3487 }
 0x544   :  { %v3490_v25 = vpop.eup %3489  ;;  %v1578_v31 = vadd.f32 1.0, %v3488_v26  ;;  %v1884_v26 = vld [vmem:[%s5308_s5 + $0xe8] sm:$0xff] }
 0x545   :  { %v1584_v0 = vadd.f32 1.0, %v3490_v25  ;;  %v3492_v53 = vpop.eup %3491  ;;  %v4873_v25 = vpack.c.bf16 %v1884_v26, %v1880_v22  ;;  %v1911_v22 = vld [vmem:[%s5308_s5 + $0x1c0] sm:$0xff] }
 0x546   :  { %3495 = vrcp.f32 %v1578_v31  ;;  %v3494_v11 = vpop.eup %3493  ;;  %v1591_v47 = vadd.f32 1.0, %v3492_v53  ;;  %v1879_v31 = vld [vmem:[%s5308_s5 + $0xc0] sm:$0xff] }
 0x547   :  { %3497 = vrcp.f32 %v1584_v0  ;;  %v1883_v0 = vld [vmem:[%s5308_s5 + $0xe0] sm:$0xff] }
 0x548   :  { %3499 = vrcp.f32 %v1591_v47  ;;  %v4881_v53 = vpack.c.bf16 %v1883_v0, %v1879_v31  ;;  %v1891_v47 = vld [vmem:[%s5308_s5 + $0x120] sm:$0xff] }
 0x549   :  { %v1915_v26 = vld [vmem:[%s5308_s5 + $0x1e0] sm:$0xff] }
 0x54a   :  { %v4953_v31 = vpack.c.bf16 %v1915_v26, %v1911_v22  ;;  %v4964_v22 = vld [vmem:[%s5304_s1 + $0x28] sm:$0xff] }
 0x54b   :  { %vm1845_vm5 = vcmp.gt.f32.partialorder %v4964_v22, 0.0 }
 0x550   :  { %v3496_v59 = vpop.eup %3495 }
 0x551   :  { %v3498_v42 = vpop.eup %3497  ;;  %v1595_v17 = vmul.f32 %v3496_v59, %v3494_v11  ;;  %v1888_v11 = vld [vmem:[%s5308_s5 + $0x108] sm:$0xff] }
 0x552   :  { %v1594_v49 = vmul.f32 %v3498_v42, %v4727_v7  ;;  %v3500_v46 = vpop.eup %3499  ;;  %v1892_v59 = vld [vmem:[%s5308_s5 + $0x128] sm:$0xff]  ;;  %v1887_v42 = vld [vmem:[%s5308_s5 + $0x100] sm:$0xff] }
 0x554   :  { %v1596_v41 = vadd.f32 %v1595_v17, %v1594_v49  ;;  %v4894_v17 = vpack.c.bf16 %v1892_v59, %v1888_v11  ;;  %v1896_v49 = vld [vmem:[%s5308_s5 + $0x148] sm:$0xff] }
 0x556   :  { %3501 = vtanh.f32 %v1596_v41  ;;  %v4786_v16 = vsel %vm1600_vm4, %v1596_v41, %v4727_v7  ;;  %v1856_v7 = vld [vmem:[%s5308_s5 + $0x8] sm:$0xff] }
 0x557   :  { %v3197_v10 = vpack.c.bf16 %v1860_v38, %v1856_v7  ;;  %v1900_v41 = vld [vmem:[%s5308_s5 + $0x168] sm:$0xff]  ;;  %v1895_v7 = vld [vmem:[%s5308_s5 + $0x140] sm:$0xff] }
 0x558   :  { %v1899_v38 = vld [vmem:[%s5308_s5 + $0x160] sm:$0xff] }
 0x559   :  { %3198 = vmatprep.subr.bf16.mxu0 %v3197_v10 }
 0x560   :  { %v3502_v52 = vpop.eup %3501 }
 0x561   :  { %v4788_v54 = vmul.f32 %v3502_v52, %v3500_v46  ;;  %v4905_v46 = vpack.c.bf16 %v1891_v47, %v1887_v42  ;;  %v4907_v52 = vpack.c.bf16 %v1900_v41, %v1896_v49 }
 0x563   :  { %v4794_v63 = vsel %vm1600_vm4, %v4788_v54, %v4735_v33  ;;  %v1855_v33 = vld [vmem:[%s5308_s5] sm:$0xff] }
 0x564   :  { %1739 = vmatmul.mubr.f32.vlgmr.msra.gmra.mrb[10].mxu0 %v4794_v63  ;;  %1810 = vmatmul.mubr.f32.vlgmr.msra.gmra.mrb[26].mxu1 %v4794_v63 }
 0x565   :  { %3232 = vmatpush1.bf16.msra.mxu1 %v4606_v37  ;;  %1983 = vmatprep.mubr.f32.mxu0 %v5320_v55 }
 0x566   :  { %3234 = vmatprep.subr.bf16.mxu1 %v4616_v20  ;;  %2054 = vmatprep.mubr.f32.mxu1 %v5320_v55 }
 0x569   :  { %3236 = vmatpush1.bf16.msra.mxu1 %v4624_v24 }
 0x56a   :  { %3238 = vmatprep.subr.bf16.mxu1 %v4634_v62 }
 0x56d   :  { %3240 = vmatpush1.bf16.msra.mxu1 %v4642_v29 }
 0x56e   :  { %3242 = vmatprep.subr.bf16.mxu1 %v4652_v45 }
 0x571   :  { %3244 = vmatpush1.bf16.msra.mxu1 %v4660_v9 }
 0x572   :  { %3246 = vmatprep.subr.bf16.mxu1 %v4673_v23 }
 0x575   :  { %3248 = vmatpush1.bf16.msra.mxu1 %v4684_v36 }
 0x576   :  { %3250 = vmatprep.subr.bf16.mxu1 %v4686_v40 }
 0x579   :  { %3252 = vmatpush1.bf16.msra.mxu1 %v4702_v18 }
 0x57a   :  { %3254 = vmatprep.subr.bf16.mxu1 %v4705_v43 }
 0x57d   :  { %3256 = vmatpush1.bf16.msra.mxu1 %v4530_v50  ;;  %v1859_v50 = vld [vmem:[%s5308_s5 + $0x20] sm:$0xff] }
 0x57e   :  { %3258 = vmatprep.subr.bf16.mxu1 %v4541_v61  ;;  %v4828_v61 = vpack.c.bf16 %v1859_v50, %v1855_v33  ;;  %v1904_v33 = vld [vmem:[%s5308_s5 + $0x188] sm:$0xff] }
 0x57f   :  { %v1908_v50 = vld [vmem:[%s5308_s5 + $0x1a8] sm:$0xff] }
 0x580   :  { %3200 = vmatpush1.bf16.msra.mxu0 %v4828_v61 }
 0x581   :  { %3260 = vmatpush1.bf16.msra.mxu1 %v4544_v13  ;;  %v1864_v13 = vld [vmem:[%s5308_s5 + $0x48] sm:$0xff] }
 0x582   :  { %3294 = vmatprep.subr.bf16.mxu1 %v4598_v39  ;;  %v1868_v39 = vld [vmem:[%s5308_s5 + $0x68] sm:$0xff] }
 0x583   :  { %v4837_v44 = vpack.c.bf16 %v1868_v39, %v1864_v13  ;;  %v4923_v13 = vpack.c.bf16 %v1899_v38, %v1895_v7  ;;  %v4926_v39 = vpack.c.bf16 %v1908_v50, %v1904_v33 }
 0x585   :  { %3202 = vmatprep.subr.bf16.mxu0 %v4837_v44 }
 0x586   :  { %3204 = vmatpush1.bf16.msra.mxu0 %v4845_v19 }
 0x587   :  { %3206 = vmatprep.subr.bf16.mxu0 %v4855_v5 }
 0x58a   :  { %3208 = vmatpush1.bf16.msra.mxu0 %v4863_v56 }
 0x58b   :  { %3210 = vmatprep.subr.bf16.mxu0 %v4873_v25 }
 0x58e   :  { %3212 = vmatpush1.bf16.msra.mxu0 %v4881_v53 }
 0x58f   :  { %3214 = vmatprep.subr.bf16.mxu0 %v4894_v17 }
 0x592   :  { %3216 = vmatpush1.bf16.msra.mxu0 %v4905_v46 }
 0x593   :  { %3218 = vmatprep.subr.bf16.mxu0 %v4907_v52 }
 0x596   :  { %3220 = vmatpush1.bf16.msra.mxu0 %v4923_v13 }
 0x597   :  { %3222 = vmatprep.subr.bf16.mxu0 %v4926_v39 }
 0x59a   :  { %3224 = vmatpush1.bf16.msra.mxu0 %v4941_v15 }
 0x59b   :  { %3226 = vmatprep.subr.bf16.mxu0 %v4944_v48 }
 0x59e   :  { %3228 = vmatpush1.bf16.msra.mxu0 %v4953_v31 }
 0x59f   :  { %3262 = vmatprep.subr.bf16.mxu0 %v3197_v10 }
 0x637   :  { %v1740_v0 = vpop.f32.mrb[10].mxu0  ;;  %v1811_v11 = vpop.f32.mrb[26].mxu1 }
 0x638   :  { %v1816_v59 = vadd.f32 %v1740_v0, %v4264_v60  ;;  %v1742_v42 = vpop.f32.mrb[11].mxu0  ;;  %v1813_v47 = vpop.f32.mrb[27].mxu1  ;;  %v3399_v50 = vadd.f32 %v1811_v11, %v4276_v27 }
 0x639   :  { %v1817_v49 = vadd.f32 %v1742_v42, %v4266_v1  ;;  %v3400_v38 = vadd.f32 %v1813_v47, %v4278_v30 }
 0x63a   :  { %v2667_v41 = vmul.f32 -1.442695, %v1816_v59 }
 0x63b   :  { %v2668_v7 = vmul.f32 -1.442695, %v1817_v49  ;;  %v2669_v33 = vmul.f32 -1.442695, %v3400_v38 }
 0x63c   :  { %3503 = vpow2.f32 %v2667_v41 }
 0x63d   :  { %3505 = vpow2.f32 %v2668_v7 }
 0x63e   :  { %3507 = vpow2.f32 %v2669_v33 }
 0x63f   :  { %3509 = vtanh.f32 %v3399_v50 }
 0x646   :  { %v3504_v6 = vpop.eup %3503 }
 0x647   :  { %v3506_v14 = vpop.eup %3505  ;;  %v1823_v10 = vadd.f32 1.0, %v3504_v6 }
 0x648   :  { %v1829_v28 = vadd.f32 1.0, %v3506_v14  ;;  %v3508_v60 = vpop.eup %3507 }
 0x649   :  { %3511 = vrcp.f32 %v1823_v10  ;;  %v3510_v57 = vpop.eup %3509  ;;  %v1836_v59 = vadd.f32 1.0, %v3508_v60  ;;  %v2371_v60 = vld [vmem:[%s5309_s6 + $0x80] sm:$0xff] }
 0x64a   :  { %3513 = vrcp.f32 %v1829_v28 }
 0x64b   :  { %3515 = vrcp.f32 %v1836_v59 }
 0x653   :  { %v3512_v1 = vpop.eup %3511 }
 0x654   :  { %v3514_v26 = vpop.eup %3513  ;;  %v1840_v0 = vmul.f32 %v3512_v1, %v3510_v57  ;;  %v2372_v57 = vld [vmem:[%s5309_s6 + $0x88] sm:$0xff] }
 0x655   :  { %v1839_v11 = vmul.f32 %v3514_v26, %v4786_v16  ;;  %v3516_v49 = vpop.eup %3515  ;;  %v3325_v1 = vpack.c.bf16 %v2372_v57, %v2371_v60  ;;  %v2355_v26 = vld [vmem:[%s5309_s6] sm:$0xff] }
 0x657   :  { %v1841_v42 = vadd.f32 %v1840_v0, %v1839_v11  ;;  %v2356_v0 = vld [vmem:[%s5309_s6 + $0x8] sm:$0xff]  ;;  %v2373_v11 = vld [vmem:[%s5309_s6 + $0x90] sm:$0xff] }
 0x658   :  { %v3327_v59 = vpack.c.bf16 %v2356_v0, %v2355_v26 }
 0x659   :  { %3517 = vtanh.f32 %v1841_v42  ;;  %v4971_v47 = vsel %vm1845_vm5, %v1841_v42, %v4786_v16  ;;  %v2374_v42 = vld [vmem:[%s5309_s6 + $0x98] sm:$0xff] }
 0x663   :  { %v3518_v41 = vpop.eup %3517 }
 0x664   :  { %v4973_v7 = vmul.f32 %v3518_v41, %v3516_v49  ;;  %v2357_v49 = vld [vmem:[%s5309_s6 + $0x10] sm:$0xff]  ;;  %v2358_v41 = vld [vmem:[%s5309_s6 + $0x18] sm:$0xff] }
 0x666   :  { %v4979_v38 = vsel %vm1845_vm5, %v4973_v7, %v4794_v63 }
 0x667   :  { %1984 = vmatmul.mubr.f32.vlgmr.msra.gmra.mrb[12].mxu0 %v4979_v38  ;;  %2055 = vmatmul.mubr.f32.vlgmr.msra.gmra.mrb[28].mxu1 %v4979_v38 }
 0x668   :  { %3264 = vmatpush1.bf16.msra.mxu0 %v4828_v61  ;;  %3296 = vmatpush1.bf16.msra.mxu1 %v4606_v37  ;;  %v2150_v37 = vld [vmem:[%s5308_s5 + $0x190] sm:$0xff] }
 0x669   :  { %3266 = vmatprep.subr.bf16.mxu0 %v4837_v44  ;;  %3298 = vmatprep.subr.bf16.mxu1 %v4616_v20  ;;  %v2154_v20 = vld [vmem:[%s5308_s5 + $0x1b0] sm:$0xff] }
 0x66a   :  { %2228 = vmatprep.mubr.f32.mxu0 %v5320_v55  ;;  %2299 = vmatprep.mubr.f32.mxu1 %v5320_v55 }
 0x66c   :  { %3268 = vmatpush1.bf16.msra.mxu0 %v4845_v19  ;;  %3300 = vmatpush1.bf16.msra.mxu1 %v4624_v24  ;;  %v2159_v24 = vld [vmem:[%s5308_s5 + $0x1d8] sm:$0xff] }
 0x66d   :  { %3270 = vmatprep.subr.bf16.mxu0 %v4855_v5  ;;  %3302 = vmatprep.subr.bf16.mxu1 %v4634_v62  ;;  %v3319_v62 = vpack.c.bf16 %v2154_v20, %v2150_v37  ;;  %v2375_v37 = vld [vmem:[%s5309_s6 + $0xa0] sm:$0xff]  ;;  %v2376_v20 = vld [vmem:[%s5309_s6 + $0xa8] sm:$0xff] }
 0x670   :  { %3272 = vmatpush1.bf16.msra.mxu0 %v4863_v56  ;;  %3304 = vmatpush1.bf16.msra.mxu1 %v4642_v29  ;;  %v2163_v29 = vld [vmem:[%s5308_s5 + $0x1f8] sm:$0xff] }
 0x671   :  { %3274 = vmatprep.subr.bf16.mxu0 %v4873_v25  ;;  %3306 = vmatprep.subr.bf16.mxu1 %v4652_v45  ;;  %v2158_v45 = vld [vmem:[%s5308_s5 + $0x1d0] sm:$0xff] }
 0x674   :  { %3276 = vmatpush1.bf16.msra.mxu0 %v4881_v53  ;;  %3308 = vmatpush1.bf16.msra.mxu1 %v4660_v9  ;;  %v2162_v9 = vld [vmem:[%s5308_s5 + $0x1f0] sm:$0xff] }
 0x675   :  { %3278 = vmatprep.subr.bf16.mxu0 %v4894_v17  ;;  %3310 = vmatprep.subr.bf16.mxu1 %v4673_v23  ;;  %v3321_v23 = vpack.c.bf16 %v2163_v29, %v2159_v24  ;;  %v3333_v24 = vpack.c.bf16 %v2376_v20, %v2375_v37  ;;  %v2360_v29 = vld [vmem:[%s5309_s6 + $0x28] sm:$0xff] }
 0x678   :  { %3280 = vmatpush1.bf16.msra.mxu0 %v4905_v46  ;;  %3312 = vmatpush1.bf16.msra.mxu1 %v4684_v36  ;;  %v3323_v36 = vpack.c.bf16 %v2162_v9, %v2158_v45  ;;  %v2377_v9 = vld [vmem:[%s5309_s6 + $0xb0] sm:$0xff] }
 0x679   :  { %3282 = vmatprep.subr.bf16.mxu0 %v4907_v52  ;;  %3314 = vmatprep.subr.bf16.mxu1 %v4686_v40 }
 0x67c   :  { %3284 = vmatpush1.bf16.msra.mxu0 %v4923_v13  ;;  %3316 = vmatpush1.bf16.msra.mxu1 %v4702_v18  ;;  %v5037_v13 = vld [vmem:[%s5304_s1 + $0x30] sm:$0xff] }
 0x67d   :  { %3286 = vmatprep.subr.bf16.mxu0 %v4926_v39  ;;  %3318 = vmatprep.subr.bf16.mxu1 %v4705_v43  ;;  %vm2090_vm6 = vcmp.gt.f32.partialorder %v5037_v13, 0.0 }
 0x680   :  { %3288 = vmatpush1.bf16.msra.mxu0 %v4941_v15  ;;  %3320 = vmatpush1.bf16.msra.mxu1 %v3319_v62  ;;  %v2359_v62 = vld [vmem:[%s5309_s6 + $0x20] sm:$0xff] }
 0x681   :  { %3290 = vmatprep.subr.bf16.mxu0 %v4944_v48  ;;  %3322 = vmatprep.subr.bf16.mxu1 %v3321_v23  ;;  %v3335_v45 = vpack.c.bf16 %v2360_v29, %v2359_v62  ;;  %v2378_v23 = vld [vmem:[%s5309_s6 + $0xb8] sm:$0xff] }
 0x684   :  { %3292 = vmatpush1.bf16.msra.mxu0 %v4953_v31  ;;  %3324 = vmatpush1.bf16.msra.mxu1 %v3323_v36  ;;  %v3337_v36 = vpack.c.bf16 %v2378_v23, %v2377_v9 }
 0x685   :  { %3326 = vmatprep.subr.bf16.mxu0 %v3325_v1 }
 0x73a   :  { %v1985_v40 = vpop.f32.mrb[12].mxu0  ;;  %v2056_v18 = vpop.f32.mrb[28].mxu1 }
 0x73b   :  { %v2061_v43 = vadd.f32 %v1985_v40, %v4268_v2  ;;  %v1987_v55 = vpop.f32.mrb[13].mxu0  ;;  %v2058_v16 = vpop.f32.mrb[29].mxu1  ;;  %v3401_v56 = vadd.f32 %v2056_v18, %v4276_v27  ;;  %v2361_v40 = vld [vmem:[%s5309_s6 + $0x30] sm:$0xff]  ;;  %v2362_v18 = vld [vmem:[%s5309_s6 + $0x38] sm:$0xff] }
 0x73c   :  { %v2062_v63 = vadd.f32 %v1987_v55, %v4270_v4  ;;  %v3402_v19 = vadd.f32 %v2058_v16, %v4278_v30  ;;  %v2379_v55 = vld [vmem:[%s5309_s6 + $0xc0] sm:$0xff]  ;;  %v2380_v16 = vld [vmem:[%s5309_s6 + $0xc8] sm:$0xff] }
 0x73d   :  { %v2670_v61 = vmul.f32 -1.442695, %v2061_v43  ;;  %v3339_v43 = vpack.c.bf16 %v2362_v18, %v2361_v40 }
 0x73e   :  { %v2671_v44 = vmul.f32 -1.442695, %v2062_v63  ;;  %v2672_v5 = vmul.f32 -1.442695, %v3402_v19  ;;  %v3341_v63 = vpack.c.bf16 %v2380_v16, %v2379_v55 }
 0x73f   :  { %3519 = vpow2.f32 %v2670_v61  ;;  %v2363_v61 = vld [vmem:[%s5309_s6 + $0x40] sm:$0xff] }
 0x740   :  { %3521 = vpow2.f32 %v2671_v44  ;;  %v2364_v44 = vld [vmem:[%s5309_s6 + $0x48] sm:$0xff] }
 0x741   :  { %3523 = vpow2.f32 %v2672_v5  ;;  %v3343_v19 = vpack.c.bf16 %v2364_v44, %v2363_v61  ;;  %v2381_v5 = vld [vmem:[%s5309_s6 + $0xd0] sm:$0xff] }
 0x742   :  { %3525 = vtanh.f32 %v3401_v56  ;;  %v2382_v56 = vld [vmem:[%s5309_s6 + $0xd8] sm:$0xff] }
 0x749   :  { %v3520_v25 = vpop.eup %3519 }
 0x74a   :  { %v3522_v53 = vpop.eup %3521  ;;  %v2068_v17 = vadd.f32 1.0, %v3520_v25  ;;  %v2365_v25 = vld [vmem:[%s5309_s6 + $0x50] sm:$0xff] }
 0x74b   :  { %v2074_v46 = vadd.f32 1.0, %v3522_v53  ;;  %v3524_v2 = vpop.eup %3523  ;;  %v3345_v53 = vpack.c.bf16 %v2382_v56, %v2381_v5 }
 0x74c   :  { %3527 = vrcp.f32 %v2068_v17  ;;  %v3526_v52 = vpop.eup %3525  ;;  %v2081_v48 = vadd.f32 1.0, %v3524_v2  ;;  %v2366_v17 = vld [vmem:[%s5309_s6 + $0x58] sm:$0xff]  ;;  %v2384_v2 = vld [vmem:[%s5309_s6 + $0xe8] sm:$0xff] }
 0x74d   :  { %3529 = vrcp.f32 %v2074_v46  ;;  %v2383_v46 = vld [vmem:[%s5309_s6 + $0xe0] sm:$0xff] }
 0x74e   :  { %3531 = vrcp.f32 %v2081_v48  ;;  %v2385_v48 = vld [vmem:[%s5309_s6 + $0xf0] sm:$0xff] }
 0x756   :  { %v3528_v4 = vpop.eup %3527 }
 0x757   :  { %v3530_v39 = vpop.eup %3529  ;;  %v2085_v15 = vmul.f32 %v3528_v4, %v3526_v52  ;;  %v3347_v52 = vpack.c.bf16 %v2366_v17, %v2365_v25  ;;  %v3349_v4 = vpack.c.bf16 %v2384_v2, %v2383_v46 }
 0x758   :  { %v2084_v31 = vmul.f32 %v3530_v39, %v4971_v47  ;;  %v3532_v6 = vpop.eup %3531  ;;  %v2367_v39 = vld [vmem:[%s5309_s6 + $0x60] sm:$0xff] }
 0x75a   :  { %v2086_v33 = vadd.f32 %v2085_v15, %v2084_v31  ;;  %v2368_v15 = vld [vmem:[%s5309_s6 + $0x68] sm:$0xff]  ;;  %v2386_v31 = vld [vmem:[%s5309_s6 + $0xf8] sm:$0xff] }
 0x75c   :  { %3533 = vtanh.f32 %v2086_v33  ;;  %v5044_v50 = vsel %vm2090_vm6, %v2086_v33, %v4971_v47  ;;  %v3329_v47 = vpack.c.bf16 %v2374_v42, %v2373_v11  ;;  %v3351_v33 = vpack.c.bf16 %v2368_v15, %v2367_v39 }
 0x766   :  { %v3534_v14 = vpop.eup %3533 }
 0x767   :  { %v5046_v10 = vmul.f32 %v3534_v14, %v3532_v6  ;;  %v3353_v6 = vpack.c.bf16 %v2386_v31, %v2385_v48  ;;  %v2369_v14 = vld [vmem:[%s5309_s6 + $0x70] sm:$0xff] }
 0x769   :  { %v2091_v28 = vsel %vm2090_vm6, %v5046_v10, %v4979_v38  ;;  %v3331_v38 = vpack.c.bf16 %v2358_v41, %v2357_v49 }
 0x76a   :  { %2229 = vmatmul.mubr.f32.vlgmr.msra.gmra.mrb[14].mxu0 %v2091_v28  ;;  %2300 = vmatmul.mubr.f32.vlgmr.msra.gmra.mrb[30].mxu1 %v2091_v28  ;;  %v2370_v28 = vld [vmem:[%s5309_s6 + $0x78] sm:$0xff] }
 0x76b   :  { %3328 = vmatpush3.bf16.msra.mxu0 %v3327_v59  ;;  %v3355_v60 = vpack.c.bf16 %v2370_v28, %v2369_v14 }
 0x76c   :  { %3330 = vmatprep.subr.bf16.mxu0 %v3329_v47 }
 0x76f   :  { %3332 = vmatpush3.bf16.msra.mxu0 %v3331_v38 }
 0x770   :  { %3334 = vmatprep.subr.bf16.mxu0 %v3333_v24 }
 0x773   :  { %3336 = vmatpush3.bf16.msra.mxu0 %v3335_v45 }
 0x774   :  { %3338 = vmatprep.subr.bf16.mxu0 %v3337_v36 }
 0x777   :  { %3340 = vmatpush3.bf16.msra.mxu0 %v3339_v43 }
 0x778   :  { %3342 = vmatprep.subr.bf16.mxu0 %v3341_v63 }
 0x77b   :  { %3344 = vmatpush3.bf16.msra.mxu0 %v3343_v19 }
 0x77c   :  { %3346 = vmatprep.subr.bf16.mxu0 %v3345_v53 }
 0x77f   :  { %3348 = vmatpush3.bf16.msra.mxu0 %v3347_v52 }
 0x780   :  { %3350 = vmatprep.subr.bf16.mxu0 %v3349_v4 }
 0x783   :  { %3352 = vmatpush3.bf16.msra.mxu0 %v3351_v33 }
 0x784   :  { %3354 = vmatprep.subr.bf16.mxu0 %v3353_v6 }
 0x787   :  { %3356 = vmatpush3.bf16.msra.mxu0 %v3355_v60 }
 0x83d   :  { %v2230_v57 = vpop.f32.mrb[14].mxu0  ;;  %v2301_v1 = vpop.f32.mrb[30].mxu1 }
 0x83e   :  { %v2306_v26 = vadd.f32 %v2230_v57, %v4272_v8  ;;  %v2232_v0 = vpop.f32.mrb[15].mxu0  ;;  %v2303_v59 = vpop.f32.mrb[31].mxu1  ;;  %v3403_v38 = vadd.f32 %v2301_v1, %v4276_v27  ;;  %v2334_v27 = vld [vmem:[%s5304_s1 + $0x38] sm:$0xff] }
 0x83f   :  { %v2307_v11 = vadd.f32 %v2232_v0, %v4274_v35  ;;  %v3404_v49 = vadd.f32 %v2303_v59, %v4278_v30  ;;  %vm2335_vm7 = vcmp.gt.f32.partialorder %v2334_v27, 0.0 }
 0x840   :  { %v2673_v42 = vmul.f32 -1.442695, %v2306_v26 }
 0x841   :  { %v2674_v47 = vmul.f32 -1.442695, %v2307_v11  ;;  %v2675_v41 = vmul.f32 -1.442695, %v3404_v49 }
 0x842   :  { %3535 = vpow2.f32 %v2673_v42 }
 0x843   :  { %3537 = vpow2.f32 %v2674_v47 }
 0x844   :  { %3539 = vpow2.f32 %v2675_v41 }
 0x845   :  { %3541 = vtanh.f32 %v3403_v38 }
 0x84c   :  { %v3536_v37 = vpop.eup %3535 }
 0x84d   :  { %v3538_v20 = vpop.eup %3537  ;;  %v2313_v24 = vadd.f32 1.0, %v3536_v37 }
 0x84e   :  { %v2319_v62 = vadd.f32 1.0, %v3538_v20  ;;  %v3540_v8 = vpop.eup %3539 }
 0x84f   :  { %3543 = vrcp.f32 %v2313_v24  ;;  %v3542_v29 = vpop.eup %3541  ;;  %v2326_v23 = vadd.f32 1.0, %v3540_v8 }
 0x850   :  { %3545 = vrcp.f32 %v2319_v62 }
 0x851   :  { %3547 = vrcp.f32 %v2326_v23 }
 0x859   :  { %v3544_v35 = vpop.eup %3543 }
 0x85a   :  { %v3546_v45 = vpop.eup %3545  ;;  %v2330_v9 = vmul.f32 %v3544_v35, %v3542_v29 }
 0x85b   :  { %v2329_v36 = vmul.f32 %v3546_v45, %v5044_v50  ;;  %v3548_v40 = vpop.eup %3547  ;;  %v5321_v50 = vld [vmem:[#allocation8_spill] sm:$0xff] }
 0x85d   :  { %v2331_v30 = vadd.f32 %v2330_v9, %v2329_v36 }
 0x85f   :  { %3549 = vtanh.f32 %v2331_v30 }
 0x869   :  { %v3550_v18 = vpop.eup %3549 }
 0x86a   :  { %v2333_v43 = vmul.f32 %v3550_v18, %v3548_v40 }
 0x86c   :  { %2677 = vmatprep.mubr.msk.f32.mxu0 %vm2335_vm7, %v2333_v43 }
 0x86d   :  { %2678 = vmatmul.mubr.msk.f32.vlgmr.msra.gmra.mrb[16].mxu0 %vm621_vm0, %v4290_v58 }
 0x86e   :  { %2679 = vmatprep.mubr.msk.f32.mxu0 %vm2090_vm6, %v5046_v10 }
 0x871   :  { %2680 = vmatmul.mubr.msk.f32.gmra.mrb[18].mxu0 %vm865_vm1, %v4479_v12 }
 0x872   :  { %2681 = vmatprep.mubr.msk.f32.mxu0 %vm1845_vm5, %v4973_v7 }
 0x875   :  { %2682 = vmatmul.mubr.msk.f32.gmra.mrb[20].mxu0 %vm1110_vm2, %v5321_v50 }
 0x876   :  { %2683 = vmatprep.mubr.msk.f32.mxu0 %vm1600_vm4, %v4788_v54 }
 0x879   :  { %2684 = vmatmul.mubr.msk.f32.gmra.mrb[22].mxu0 %vm1355_vm3, %v4729_v32 }
 0x87a   :  { %2685 = vmatprep.mubr.msk.f32.mxu0 %vm1355_vm3, %v4729_v32  ;;  %v2676_v32 = vld [vmem:[%s5310_s7] ss:$0 sm:$0xff] }
 0x87d   :  { %2686 = vmatmul.mubr.msk.f32.gmra.mrb[24].mxu0 %vm1600_vm4, %v4788_v54 }
 0x87e   :  { %2687 = vmatprep.mubr.msk.f32.mxu0 %vm1110_vm2, %v5321_v50 }
 0x881   :  { %2688 = vmatmul.mubr.msk.f32.gmra.mrb[26].mxu0 %vm1845_vm5, %v4973_v7 }
 0x882   :  { %2689 = vmatprep.mubr.msk.f32.mxu0 %vm865_vm1, %v4479_v12 }
 0x885   :  { %2690 = vmatmul.mubr.msk.f32.gmra.mrb[28].mxu0 %vm2090_vm6, %v5046_v10 }
 0x886   :  { %2691 = vmatprep.mubr.msk.f32.mxu0 %vm621_vm0, %v4290_v58 }
 0x889   :  { %2692 = vmatmul.mubr.msk.f32.gmra.mrb[30].mxu0 %vm2335_vm7, %v2333_v43 }
 0x940   :  { %v2725_v3 = vpop.f32.mrb[16].mxu0 }
 0x941   :  { %v2726_v34 = vpop.f32.mrb[17].mxu0 }
 0x942   :  { %v2727_v54 = vadd.f32 %v2726_v34, %v2725_v3 }
 0x944   :  { %v5203_v22 = vadd.f32 %v2727_v54, %v2676_v32  ;;  %v2728_v21 = vpop.f32.mrb[18].mxu0 }
 0x945   :  { %v2729_v12 = vpop.f32.mrb[19].mxu0 }
 0x946   :  { %v2730_v7 = vadd.f32 %v2729_v12, %v2728_v21  ;;  %2499 = vmax.xlane.f32.xlu0 %v5203_v22 }
 0x948   :  { %v5206_v13 = vadd.f32 %v2730_v7, %v2676_v32  ;;  %v2731_v51 = vpop.f32.mrb[20].mxu0 }
 0x949   :  { %v2732_v58 = vpop.f32.mrb[21].mxu0 }
 0x94a   :  { %v2733_v10 = vadd.f32 %v2732_v58, %v2731_v51  ;;  %2501 = vmax.xlane.f32.xlu0 %v5206_v13 }
 0x94c   :  { %v5209_v16 = vadd.f32 %v2733_v10, %v2676_v32  ;;  %v2734_v63 = vpop.f32.mrb[22].mxu0  ;;  %v2579_v10 = vld [vmem:[%s5305_s2] sm:$0xff] }
 0x94d   :  { %v2735_v61 = vpop.f32.mrb[23].mxu0 }
 0x94e   :  { %v2736_v44 = vadd.f32 %v2735_v61, %v2734_v63  ;;  %2503 = vmax.xlane.f32.xlu1 %v5209_v16 }
 0x950   :  { %v5212_v19 = vadd.f32 %v2736_v44, %v2676_v32  ;;  %v2737_v5 = vpop.f32.mrb[24].mxu0 }
 0x951   :  { %v2738_v56 = vpop.f32.mrb[25].mxu0 }
 0x952   :  { %v2739_v25 = vadd.f32 %v2738_v56, %v2737_v5  ;;  %2505 = vmax.xlane.f32.xlu1 %v5212_v19 }
 0x954   :  { %v5215_v53 = vadd.f32 %v2739_v25, %v2676_v32  ;;  %v2740_v17 = vpop.f32.mrb[26].mxu0 }
 0x955   :  { %v2741_v46 = vpop.f32.mrb[27].mxu0 }
 0x956   :  { %v2742_v2 = vadd.f32 %v2741_v46, %v2740_v17  ;;  %2507 = vmax.xlane.f32.xlu0 %v5215_v53  ;;  %v2580_v17 = vld [vmem:[%s5305_s2 + $0x8] sm:$0xff] }
 0x958   :  { %v5218_v52 = vadd.f32 %v2742_v2, %v2676_v32  ;;  %v2743_v4 = vpop.f32.mrb[28].mxu0 }
 0x959   :  { %v2744_v39 = vpop.f32.mrb[29].mxu0 }
 0x95a   :  { %v2745_v15 = vadd.f32 %v2744_v39, %v2743_v4  ;;  %2509 = vmax.xlane.f32.xlu1 %v5218_v52 }
 0x95c   :  { %v5221_v48 = vadd.f32 %v2745_v15, %v2676_v32  ;;  %v2746_v31 = vpop.f32.mrb[30].mxu0 }
 0x95d   :  { %v2747_v33 = vpop.f32.mrb[31].mxu0 }
 0x95e   :  { %v2748_v6 = vadd.f32 %v2747_v33, %v2746_v31  ;;  %2511 = vmax.xlane.f32.xlu0 %v5221_v48 }
 0x960   :  { %v5224_v14 = vadd.f32 %v2748_v6, %v2676_v32 }
 0x962   :  { %2513 = vmax.xlane.f32.xlu1 %v5224_v14 }
 0x9d3   :  { %v2500_v28 = vpop.xlane.xlu0 %2499 }
 0x9d4   :  { %v2515_v60 = vsub.f32 %v5203_v22, %v2500_v28 }
 0x9d6   :  { %v2523_v57 = vmul.f32 1.442695, %v2515_v60 }
 0x9d7   :  { %v2502_v1 = vpop.xlane.xlu0 %2501 }
 0x9d8   :  { %3551 = vpow2.f32 %v2523_v57  ;;  %v2516_v26 = vsub.f32 %v5206_v13, %v2502_v1 }
 0x9da   :  { %v2525_v0 = vmul.f32 1.442695, %v2516_v26 }
 0x9db   :  { %v5229_v59 = vpop.xlane.xlu1 %2503 }
 0x9dc   :  { %3553 = vpow2.f32 %v2525_v0  ;;  %v2517_v11 = vsub.f32 %v5209_v16, %v5229_v59 }
 0x9de   :  { %v2527_v42 = vmul.f32 1.442695, %v2517_v11 }
 0x9df   :  { %v5233_v47 = vpop.xlane.xlu1 %2505 }
 0x9e0   :  { %3555 = vpow2.f32 %v2527_v42  ;;  %v2518_v49 = vsub.f32 %v5212_v19, %v5233_v47 }
 0x9e2   :  { %v3552_v41 = vpop.eup %3551  ;;  %v2529_v38 = vmul.f32 1.442695, %v2518_v49 }
 0x9e3   :  { %2539 = vadd.xlane.f32.xlu0 %v3552_v41  ;;  %v5237_v37 = vpop.xlane.xlu0 %2507 }
 0x9e4   :  { %3557 = vpow2.f32 %v2529_v38  ;;  %v2519_v20 = vsub.f32 %v5215_v53, %v5237_v37 }
 0x9e6   :  { %v3554_v24 = vpop.eup %3553  ;;  %v2531_v62 = vmul.f32 1.442695, %v2519_v20 }
 0x9e7   :  { %v5241_v8 = vpop.xlane.xlu1 %2509  ;;  %2541 = vadd.xlane.f32.xlu1 %v3554_v24 }
 0x9e8   :  { %3559 = vpow2.f32 %v2531_v62  ;;  %v2520_v29 = vsub.f32 %v5218_v52, %v5241_v8 }
 0x9ea   :  { %v3556_v35 = vpop.eup %3555  ;;  %v2533_v45 = vmul.f32 1.442695, %v2520_v29 }
 0x9eb   :  { %2543 = vadd.xlane.f32.xlu0 %v3556_v35  ;;  %v5245_v9 = vpop.xlane.xlu0 %2511 }
 0x9ec   :  { %3561 = vpow2.f32 %v2533_v45  ;;  %v2521_v23 = vsub.f32 %v5221_v48, %v5245_v9 }
 0x9ee   :  { %v3558_v36 = vpop.eup %3557  ;;  %v2535_v30 = vmul.f32 1.442695, %v2521_v23 }
 0x9ef   :  { %v5249_v27 = vpop.xlane.xlu1 %2513  ;;  %2545 = vadd.xlane.f32.xlu1 %v3558_v36 }
 0x9f0   :  { %3563 = vpow2.f32 %v2535_v30  ;;  %v2522_v40 = vsub.f32 %v5224_v14, %v5249_v27 }
 0x9f2   :  { %v3560_v18 = vpop.eup %3559  ;;  %v2537_v43 = vmul.f32 1.442695, %v2522_v40  ;;  %v2586_v40 = vld [vmem:[%s5305_s2 + $0x38] sm:$0xff] }
 0x9f3   :  { %2547 = vadd.xlane.f32.xlu0 %v3560_v18 }
 0x9f4   :  { %3565 = vpow2.f32 %v2537_v43 }
 0x9f6   :  { %v3562_v50 = vpop.eup %3561 }
 0x9f7   :  { %2549 = vadd.xlane.f32.xlu1 %v3562_v50 }
 0x9fa   :  { %v3564_v55 = vpop.eup %3563 }
 0x9fb   :  { %2551 = vadd.xlane.f32.xlu0 %v3564_v55 }
 0x9fe   :  { %v3566_v3 = vpop.eup %3565 }
 0x9ff   :  { %2553 = vadd.xlane.f32.xlu1 %v3566_v3 }
 0xa70   :  { %v2540_v32 = vpop.xlane.xlu0 %2539 }
 0xa71   :  { %3567 = vlog2.f32 %v2540_v32 }
 0xa74   :  { %v2542_v34 = vpop.xlane.xlu1 %2541 }
 0xa75   :  { %3569 = vlog2.f32 %v2542_v34 }
 0xa78   :  { %v2544_v54 = vpop.xlane.xlu0 %2543 }
 0xa79   :  { %3571 = vlog2.f32 %v2544_v54 }
 0xa7b   :  { %v3568_v21 = vpop.eup %3567 }
 0xa7c   :  { %v2556_v12 = vmul.f32 0.6931472, %v3568_v21  ;;  %v2546_v7 = vpop.xlane.xlu1 %2545 }
 0xa7d   :  { %3573 = vlog2.f32 %v2546_v7 }
 0xa7e   :  { %v2571_v51 = vadd.f32 %v2556_v12, %v2500_v28 }
 0xa7f   :  { %v3570_v58 = vpop.eup %3569 }
 0xa80   :  { %v2558_v63 = vmul.f32 0.6931472, %v3570_v58  ;;  %v2548_v61 = vpop.xlane.xlu0 %2547  ;;  %v2587_v44 = vsub.f32 %v2571_v51, %v5203_v22  ;;  %v2581_v22 = vld [vmem:[%s5305_s2 + $0x10] sm:$0xff] }
 0xa81   :  { %3575 = vlog2.f32 %v2548_v61 }
 0xa82   :  { %v2572_v5 = vadd.f32 %v2558_v63, %v2502_v1  ;;  %v2595_v56 = vmul.f32 %v2587_v44, %v2579_v10 }
 0xa83   :  { %v3572_v25 = vpop.eup %3571 }
 0xa84   :  { %v2560_v46 = vmul.f32 0.6931472, %v3572_v25  ;;  %v2550_v2 = vpop.xlane.xlu1 %2549  ;;  %2603 = vadd.xlane.f32.xlu0 %v2595_v56  ;;  %v2588_v4 = vsub.f32 %v2572_v5, %v5206_v13  ;;  %v2582_v13 = vld [vmem:[%s5305_s2 + $0x18] sm:$0xff] }
 0xa85   :  { %3577 = vlog2.f32 %v2550_v2 }
 0xa86   :  { %v2573_v39 = vadd.f32 %v2560_v46, %v5229_v59  ;;  %v2596_v15 = vmul.f32 %v2588_v4, %v2580_v17 }
 0xa87   :  { %v3574_v31 = vpop.eup %3573 }
 0xa88   :  { %v2562_v33 = vmul.f32 0.6931472, %v3574_v31  ;;  %2605 = vadd.xlane.f32.xlu1 %v2596_v15  ;;  %v2552_v6 = vpop.xlane.xlu0 %2551  ;;  %v2589_v28 = vsub.f32 %v2573_v39, %v5209_v16  ;;  %v2583_v16 = vld [vmem:[%s5305_s2 + $0x20] sm:$0xff] }
 0xa89   :  { %3579 = vlog2.f32 %v2552_v6 }
 0xa8a   :  { %v2574_v60 = vadd.f32 %v2562_v33, %v5233_v47  ;;  %v2597_v57 = vmul.f32 %v2589_v28, %v2581_v22 }
 0xa8b   :  { %v3576_v1 = vpop.eup %3575 }
 0xa8c   :  { %v2564_v26 = vmul.f32 0.6931472, %v3576_v1  ;;  %v2554_v0 = vpop.xlane.xlu1 %2553  ;;  %2607 = vadd.xlane.f32.xlu0 %v2597_v57  ;;  %v2590_v59 = vsub.f32 %v2574_v60, %v5212_v19  ;;  %v2584_v19 = vld [vmem:[%s5305_s2 + $0x28] sm:$0xff] }
 0xa8d   :  { %3581 = vlog2.f32 %v2554_v0 }
 0xa8e   :  { %v2575_v11 = vadd.f32 %v2564_v26, %v5237_v37  ;;  %v2598_v42 = vmul.f32 %v2590_v59, %v2582_v13 }
 0xa8f   :  { %v3578_v49 = vpop.eup %3577 }
 0xa90   :  { %v2566_v47 = vmul.f32 0.6931472, %v3578_v49  ;;  %2609 = vadd.xlane.f32.xlu1 %v2598_v42  ;;  %v2591_v41 = vsub.f32 %v2575_v11, %v5215_v53  ;;  %v2585_v53 = vld [vmem:[%s5305_s2 + $0x30] sm:$0xff]  ;;  %s3608_s2 = smov [#allocation4]  }
 0xa91   :  { %s2642_s26 = sshll.u32 %s3608_s2, 4  ;;  %s2643_s26 = int_to_ptr.vmem [resolvable:$true] %s2642_s26 }
 0xa92   :  { %v2576_v38 = vadd.f32 %v2566_v47, %v5241_v8  ;;  %v2599_v20 = vmul.f32 %v2591_v41, %v2583_v16  ;;  %s3583_s27 = scalar_lea.vmem %s2643_s26, 16  ;;  %s3587_s28 = scalar_lea.vmem %s2643_s26, 32 }
 0xa93   :  { %v3580_v24 = vpop.eup %3579  ;;  %p3584_p0 = scmp.ne.s32.totalorder %s2643_s26, %s3583_s27  ;;  %p3588_p1 = scmp.lt.s32.totalorder %s2643_s26, %s2643_s26 }
 0xa94   :  { %v2568_v62 = vmul.f32 0.6931472, %v3580_v24  ;;  %2611 = vadd.xlane.f32.xlu0 %v2599_v20  ;;  %v2592_v37 = vsub.f32 %v2576_v38, %v5218_v52  ;;  %p3589_p2 = scmp.lt.s32.totalorder %s3587_s28, %s3583_s27 }
 0xa96   :  { %v2577_v29 = vadd.f32 %v2568_v62, %v5245_v9  ;;  %v2600_v35 = vmul.f32 %v2592_v37, %v2584_v19  ;;  %p3590_p3 = por %p3589_p2, %p3588_p1 }
 0xa97   :  { %v3582_v45 = vpop.eup %3581 }
 0xa98   :  { %v2570_v23 = vmul.f32 0.6931472, %v3582_v45  ;;  %2613 = vadd.xlane.f32.xlu1 %v2600_v35  ;;  %v2593_v8 = vsub.f32 %v2577_v29, %v5221_v48  ;;  %p3591_p4 = pnand %p3590_p3, %p3584_p0 }
 0xa9a   :  { %v2578_v36 = vadd.f32 %v2570_v23, %v5249_v27  ;;  %v2601_v30 = vmul.f32 %v2593_v8, %v2585_v53 }
 0xa9c   :  { %2615 = vadd.xlane.f32.xlu0 %v2601_v30  ;;  %v2594_v52 = vsub.f32 %v2578_v36, %v5224_v14 }
 0xa9e   :  { %v2602_v9 = vmul.f32 %v2594_v52, %v2586_v40 }
 0xaa0   :  { %2617 = vadd.xlane.f32.xlu1 %v2602_v9 }
 0xb11   :  { %v2604_v18 = vpop.xlane.xlu0 %2603 }
 0xb15   :  { %v2606_v43 = vpop.xlane.xlu1 %2605 }
 0xb16   :  { %v2619_v55 = vadd.f32 %v2606_v43, %v2604_v18 }
 0xb19   :  { %v2608_v50 = vpop.xlane.xlu0 %2607 }
 0xb1a   :  { %v2620_v32 = vadd.f32 %v2619_v55, %v2608_v50 }
 0xb1d   :  { %v2610_v3 = vpop.xlane.xlu1 %2609 }
 0xb1e   :  { %v2621_v48 = vadd.f32 %v2620_v32, %v2610_v3 }
 0xb21   :  { %v2612_v34 = vpop.xlane.xlu0 %2611 }
 0xb22   :  { %v2622_v27 = vadd.f32 %v2621_v48, %v2612_v34 }
 0xb25   :  { %v2614_v54 = vpop.xlane.xlu1 %2613 }
 0xb26   :  { %v2623_v12 = vadd.f32 %v2622_v27, %v2614_v54 }
 0xb29   :  { %v2616_v21 = vpop.xlane.xlu0 %2615 }
 0xb2a   :  { %v2624_v7 = vadd.f32 %v2623_v12, %v2616_v21 }
 0xb2d   :  { %v2618_v51 = vpop.xlane.xlu1 %2617 }
 0xb2e   :  { %v2625_v58 = vadd.f32 %v2624_v7, %v2618_v51 }
 0xb30   :  { %v2626_v10 = vrot.slane %v2625_v58, 4 }
 0xb32   :  { %v2627_v63 = vadd.f32 %v2626_v10, %v2625_v58 }
 0xb34   :  { %v2628_v14 = vrot.slane %v2627_v63, 2 }
 0xb36   :  { %v2629_v61 = vadd.f32 %v2628_v14, %v2627_v63 }
 0xb38   :  { %v2630_v44 = vrot.slane %v2629_v61, 1 }
 0xb3a   :  { %v2631_v5 = vadd.f32 %v2630_v44, %v2629_v61 }
 0xb3c   :  { %v2633_v56 = vmul.f32 0.0625, %v2631_v5 }
 0xb3e   :  { %2635 = vst.msk [vmem:[#allocation4] sm:$0x1] %vm2634_vm8, %v2633_v56 }
 0xb3f   :  { %3594 = shalt.err (!%p3591_p4)
}
 0xb40   :  { %s3595_s4 = scalar_lea.hbm %s5311_s8, 16 }
 0xb41   :  { %p3596_p5 = scmp.ne.s32.totalorder %s5311_s8, %s3595_s4  ;;  %p3599_p6 = scmp.lt.u32.totalorder %s3595_s4, %s5311_s8 }
 0xb43   :  { %p3601_p7 = pnand %p3599_p6, %p3596_p5 }
 0xb45   :  { %3604 = shalt.err (!%p3601_p7)
}
 0xb46   :  { %2645 = dma.vmem_to_hbm [thread:$0]  %s2643_s26, 16, %s5311_s8, [#allocation5]  }
 0xb47   :  { %3605 = dma.done.wait [#allocation5], 16  }
 0xb48   :  { %3606 = vsyncadd [#allocation5], 4294967280 }
 0xb49   :  { %2649 = vsyncpa [#allocation5], 1 }

</bundles_post_ra>
